<compile_context>
chip_gen: v5e
topology: v5e:2x2
jax: 0.10.0
libtpu: 0.0.40
codegen_flags: <defaults>
</compile_context>

<pallas_src>
import functools

import jax
import jax.numpy as jnp
from jax import lax
from jax.experimental import pallas as pl
from jax.experimental.pallas import tpu as pltpu

_LANE = 128
_SUBLANE = 8


def _round_up(n, m):
    return ((n + m - 1) // m) * m


# ----------------------------------------------------------------------------
# Pallas kernel: Taylor-series expansion of the MGLSA digital filter
#   for a in 1..taylor_order:
#       x[t] <- (1/a) * sum_{j=1}^{M} x[t-j] * c[t, j]     (x[t-j]=0 for t<j)
#       y    <- y + x
#   y <- y * exp(logK)
# ----------------------------------------------------------------------------
def _msfir_kernel(x_ref, c_ref, logk_ref, y_ref, tail_ref, *,
                  taylor_order: int, num_taps: int):
    """One (batch-row, time-tile) grid step.

    x_ref    : (1, R, 128)       samples; time index = 128*r + lane
    c_ref    : (M, 1, R, 128)    interpolated cepstrum taps 1..M (tap 0 is zero)
    logk_ref : (1, R, 128)       interpolated log gain
    y_ref    : (1, R, 128)       output
    tail_ref : (taylor_order, 1, 128) VMEM carry: last 128 samples of each
               Taylor stage's *input* from the previous time tile.
    """
    t = pl.program_id(1)

    @pl.when(t == 0)
    def _():
        # New batch row / sequence start: causal zero padding on the left.
        tail_ref[...] = jnp.zeros_like(tail_ref)

    _, R, L = x_ref.shape

    x_cur = x_ref[...].astype(jnp.float32)        # x_0 for this tile
    y = x_cur

    # Hoisted lane-index masks (built once, reused by every Taylor stage):
    # mask_j is True on lanes < j, i.e. samples whose lag-j source crosses the
    # 128-lane row boundary and must come from the "delayed by one row" copy.
    lane = lax.broadcasted_iota(jnp.int32, (1, R, L), 2)
    lane_lt = [lane < j for j in range(1, num_taps + 1)]

    # Fully unrolled Taylor loop (taylor_order is a compile-time constant).
    for a in range(1, taylor_order + 1):
        prev_row = tail_ref[a - 1]                # (1, 128) carry from previous tile
        tail_ref[a - 1] = x_cur[:, R - 1, :]      # carry for the next tile

        # x delayed by exactly 128 samples: row r holds row r-1 of x_cur,
        # row 0 holds the carried last row of the previous tile.
        if R > 1:
            x_d128 = jnp.concatenate(
                [prev_row[:, None, :], x_cur[:, :R - 1, :]], axis=1)
        else:
            x_d128 = prev_row[:, None, :]

        acc = jnp.zeros((1, R, L), jnp.float32)
        for j in range(1, num_taps + 1):          # tap 0 is zero -> skipped
            cur_r = pltpu.roll(x_cur, j, axis=2)    # lanes >= j : x[t - j]
            prv_r = pltpu.roll(x_d128, j, axis=2)   # lanes <  j : x[t - j] via delayed row
            shifted = jnp.where(lane_lt[j - 1], prv_r, cur_r)
            acc = acc + shifted * c_ref[j - 1].astype(jnp.float32)

        x_cur = acc * (1.0 / a)                   # static reciprocal multiply
        y = y + x_cur

    gain = jnp.exp(logk_ref[...].astype(jnp.float32))   # EUP
    y_ref[...] = (y * gain).astype(y_ref.dtype)


# ----------------------------------------------------------------------------
# Plain-JAX glue
# ----------------------------------------------------------------------------
def _linear_interp(c, upsampling_factor):
    """diffsptk LinearInterpolation: (B, N, D) -> (B, N*P, D).

    out[n*P + k] = c[n] * (1 - k/P) + c[n+1] * k/P, last frame replicated.
    """
    P = upsampling_factor
    if P == 1:
        return c
    B, N, D = c.shape
    c_next = jnp.concatenate([c[:, 1:], c[:, -1:]], axis=1)
    w = (jnp.arange(P, dtype=c.dtype) / P)[None, None, :, None]
    out = c[:, :, None, :] * (1.0 - w) + c_next[:, :, None, :] * w
    return out.reshape(B, N * P, D)


def multi_stage_fir_filter(x, mc, *, frame_period, taylor_order=20,
                           ignore_gain=False, phase="minimum", time_tile=2048):
    if phase != "minimum":
        # TODO(synk): phases "maximum", "zero", "mixed" not implemented.
        raise NotImplementedError("only phase='minimum' is implemented")

    B, T = x.shape

    # mgc2c with alpha=0, gamma=0 is the identity transform.
    # TODO(synk): general MelGeneralizedCepstrumToMelGeneralizedCepstrum
    # (alpha!=0 or gamma!=0) not implemented.
    c = mc.astype(jnp.float32)

    # remove_gain(c, value=0, return_gain=True)
    c0 = c[..., :1]                               # (B, N, 1) log gain
    c = c.at[..., 0].set(0.0)

    c_i = _linear_interp(c, frame_period)                 # (B, T, D)
    logk = _linear_interp(c0, frame_period)[..., 0]       # (B, T)
    if ignore_gain:
        logk = jnp.zeros_like(logk)

    M = mc.shape[-1] - 1
    if M == 0 or taylor_order == 0:
        # All Taylor correction terms vanish -> pure gain.
        return (x.astype(jnp.float32) * jnp.exp(logk)).astype(x.dtype)
    if M >= _LANE:
        # TODO(synk): filter orders >= 128 need a deeper (multi-row) halo carry.
        raise NotImplementedError("filter_order must be < 128")

    # NOTE: the PyTorch code flips c (minimum phase) and uses unfold(); the flip
    # is algebraically folded into the kernel's lag indexing. Tap 0 is zeroed by
    # remove_gain, so it is dropped here (saves MACs + 1/D of the HBM traffic).
    c_taps = jnp.transpose(c_i[..., 1:], (2, 0, 1))        # (M, B, T)

    # Lane-dense, sublane-packed layout: time -> rows of 128 lanes.
    T_up = _round_up(T, _LANE)
    if T_up <= time_tile:
        T_tile = T_up                                      # single tile
    else:
        T_tile = _round_up(min(time_tile, T_up), _SUBLANE * _LANE)
    T_pad = _round_up(T_up, T_tile)
    pad = T_pad - T
    if pad:
        x = jnp.pad(x, ((0, 0), (0, pad)))
        c_taps = jnp.pad(c_taps, ((0, 0), (0, 0), (0, pad)))
        logk = jnp.pad(logk, ((0, 0), (0, pad)))

    R_total = T_pad // _LANE
    R_tile = T_tile // _LANE
    x3 = x.reshape(B, R_total, _LANE)                      # contiguous reshape (free)
    c4 = c_taps.reshape(M, B, R_total, _LANE)
    lk3 = logk.reshape(B, R_total, _LANE)

    kernel = functools.partial(_msfir_kernel, taylor_order=taylor_order,
                               num_taps=M)
    grid = (B, T_pad // T_tile)                            # (parallel, arbitrary)

    y3 = pl.pallas_call(
        kernel,
        out_shape=jax.ShapeDtypeStruct((B, R_total, _LANE), x.dtype),
        grid=grid,
        in_specs=[
            pl.BlockSpec((1, R_tile, _LANE), lambda b, t: (b, t, 0)),
            pl.BlockSpec((M, 1, R_tile, _LANE), lambda b, t: (0, b, t, 0)),
            pl.BlockSpec((1, R_tile, _LANE), lambda b, t: (b, t, 0)),
        ],
        out_specs=pl.BlockSpec((1, R_tile, _LANE), lambda b, t: (b, t, 0)),
        scratch_shapes=[pltpu.VMEM((taylor_order, 1, _LANE), jnp.float32)],
        compiler_params=pltpu.CompilerParams(
            dimension_semantics=("parallel", "arbitrary"),
            vmem_limit_bytes=32 * 1024 * 1024,
        ),
    )(x3, c4, lk3)

    return y3.reshape(B, T_pad)[:, :T]


# ----------------------------------------------------------------------------
# Pure-JAX reference mirroring the PyTorch forward (pad -> unfold -> sum)
# ----------------------------------------------------------------------------
def _reference(x, mc, frame_period, taylor_order, ignore_gain):
    c = mc.astype(jnp.float32)
    c0 = c[..., :1]
    c = c.at[..., 0].set(0.0)
    c = c[..., ::-1]                                  # minimum-phase flip
    c = _linear_interp(c, frame_period)               # (B, T, D)
    M = mc.shape[-1] - 1
    T = x.shape[-1]
    idx = jnp.arange(T)[:, None] + jnp.arange(M + 1)[None, :]
    y = x
    xc = x
    for a in range(1, taylor_order + 1):
        xp = jnp.pad(xc, ((0, 0), (M, 0)))            # ConstantPad1d((M, 0))
        xw = xp[:, idx]                               # unfold(-1, M+1, 1)
        xc = (xw * c).sum(-1) / a
        y = y + xc
    if not ignore_gain:
        k = jnp.exp(_linear_interp(c0, frame_period))[..., 0]
        y = y * k
    return y


if __name__ == "__main__":
    key = jax.random.PRNGKey(0)
    kx, kc, kx2, kc2 = jax.random.split(key, 4)

    B = 2           # batch
    M = 7           # filter_order  -> D = M + 1 = 8 taps
    D = M + 1
    P = 8           # frame_period
    taylor_order = 6

    # Config A: multiple time tiles -> exercises the cross-tile FIR-state carry.
    N = 256
    T = N * P                      # 2048 samples -> two 1024-sample tiles
    x = jax.random.normal(kx, (B, T), dtype=jnp.float32)
    mc = 0.1 * jax.random.normal(kc, (B, N, D), dtype=jnp.float32)
    y = multi_stage_fir_filter(x, mc, frame_period=P, taylor_order=taylor_order,
                               time_tile=1024)
    y = jax.block_until_ready(y)
    y_ref = _reference(x, mc, P, taylor_order, ignore_gain=False)
    assert y.shape == (B, T)
    assert jnp.allclose(y, y_ref, rtol=1e-4, atol=1e-4), float(
        jnp.max(jnp.abs(y - y_ref)))

    # Config B: tiny single-tile case (R == 1 code path).
    N2 = 8
    T2 = N2 * P                    # 64 samples
    x2 = jax.random.normal(kx2, (B, T2), dtype=jnp.float32)
    mc2 = 0.1 * jax.random.normal(kc2, (B, N2, D), dtype=jnp.float32)
    y2 = multi_stage_fir_filter(x2, mc2, frame_period=P,
                                taylor_order=taylor_order)
    y2 = jax.block_until_ready(y2)
    y2_ref = _reference(x2, mc2, P, taylor_order, ignore_gain=False)
    assert y2.shape == (B, T2)
    assert jnp.allclose(y2, y2_ref, rtol=1e-4, atol=1e-4), float(
        jnp.max(jnp.abs(y2 - y2_ref)))

    print("KERNEL_OK")
</pallas_src>

<mosaic_0001>
module attributes {stable_mosaic.version = 11 : i64} {
  func.func @_msfir_kernel(%arg0: i32, %arg1: i32, %arg2: memref<1x8x128xf32, #tpu.memory_space<vmem>>, %arg3: memref<7x1x8x128xf32, #tpu.memory_space<vmem>>, %arg4: memref<1x8x128xf32, #tpu.memory_space<vmem>>, %arg5: memref<1x8x128xf32, #tpu.memory_space<vmem>>, %arg6: memref<6x1x128xf32, #tpu.memory_space<vmem>>) attributes {dimension_semantics = [#tpu.dimension_semantics<parallel>, #tpu.dimension_semantics<arbitrary>], iteration_bounds = array<i64: 2, 2>, scalar_prefetch = 0 : i64, scratch_operands = 1 : i64, tpu.core_type = #tpu.core_type<tc>, window_params = [{transform_indices = @transform_0, window_bounds = array<i64: 1, 8, 128>}, {transform_indices = @transform_1, window_bounds = array<i64: 7, 1, 8, 128>}, {transform_indices = @transform_2, window_bounds = array<i64: 1, 8, 128>}, {transform_indices = @transform_3, window_bounds = array<i64: 1, 8, 128>}]} {
    %c0_i32 = arith.constant 0 : i32
    %0 = arith.cmpi eq, %arg1, %c0_i32 : i32
    %1 = arith.extui %0 : i1 to i32
    %c0_i32_0 = arith.constant 0 : i32
    %2 = arith.cmpi ne, %1, %c0_i32_0 : i32
    scf.if %2 {
      %cst_302 = arith.constant 0.000000e+00 : f32
      %401 = vector.broadcast %cst_302 : f32 to vector<6x1x128xf32>
      %c0_303 = arith.constant 0 : index
      %c0_304 = arith.constant 0 : index
      %c0_305 = arith.constant 0 : index
      %402 = vector.load %arg6[%c0_303, %c0_304, %c0_305] : memref<6x1x128xf32, #tpu.memory_space<vmem>>, vector<6x1x128xf32>
      tpu.vector_store %arg6[%c0_303, %c0_304, %c0_305], %401 {strides = array<i32>} : memref<6x1x128xf32, #tpu.memory_space<vmem>>, vector<6x1x128xf32>,
    } else {
    }
    %c0 = arith.constant 0 : index
    %c0_1 = arith.constant 0 : index
    %c0_2 = arith.constant 0 : index
    %3 = vector.load %arg2[%c0, %c0_1, %c0_2] : memref<1x8x128xf32, #tpu.memory_space<vmem>>, vector<1x8x128xf32>
    %4 = tpu.iota {dimensions = array<i32: 2>} : vector<1x8x128xi32>
    %c1_i32 = arith.constant 1 : i32
    %5 = vector.broadcast %c1_i32 : i32 to vector<1x8x128xi32>
    %6 = arith.cmpi slt, %4, %5 : vector<1x8x128xi32>
    %c2_i32 = arith.constant 2 : i32
    %7 = vector.broadcast %c2_i32 : i32 to vector<1x8x128xi32>
    %8 = arith.cmpi slt, %4, %7 : vector<1x8x128xi32>
    %c3_i32 = arith.constant 3 : i32
    %9 = vector.broadcast %c3_i32 : i32 to vector<1x8x128xi32>
    %10 = arith.cmpi slt, %4, %9 : vector<1x8x128xi32>
    %c4_i32 = arith.constant 4 : i32
    %11 = vector.broadcast %c4_i32 : i32 to vector<1x8x128xi32>
    %12 = arith.cmpi slt, %4, %11 : vector<1x8x128xi32>
    %c5_i32 = arith.constant 5 : i32
    %13 = vector.broadcast %c5_i32 : i32 to vector<1x8x128xi32>
    %14 = arith.cmpi slt, %4, %13 : vector<1x8x128xi32>
    %c6_i32 = arith.constant 6 : i32
    %15 = vector.broadcast %c6_i32 : i32 to vector<1x8x128xi32>
    %16 = arith.cmpi slt, %4, %15 : vector<1x8x128xi32>
    %c7_i32 = arith.constant 7 : i32
    %17 = vector.broadcast %c7_i32 : i32 to vector<1x8x128xi32>
    %18 = arith.cmpi slt, %4, %17 : vector<1x8x128xi32>
    %c0_3 = arith.constant 0 : index
    %c0_4 = arith.constant 0 : index
    %c0_5 = arith.constant 0 : index
    %19 = vector.load %arg6[%c0_3, %c0_4, %c0_5] : memref<6x1x128xf32, #tpu.memory_space<vmem>>, vector<1x1x128xf32>
    %20 = vector.shape_cast %19 : vector<1x1x128xf32> to vector<1x128xf32>
    %21 = vector.extract_strided_slice %3 {offsets = [0, 7, 0], sizes = [1, 1, 128], strides = [1, 1, 1]} : vector<1x8x128xf32> to vector<1x1x128xf32>
    %22 = vector.shape_cast %21 : vector<1x1x128xf32> to vector<1x128xf32>
    %c0_6 = arith.constant 0 : index
    %c0_7 = arith.constant 0 : index
    %c0_8 = arith.constant 0 : index
    %23 = vector.load %arg6[%c0_6, %c0_7, %c0_8] : memref<6x1x128xf32, #tpu.memory_space<vmem>>, vector<1x1x128xf32>
    %24 = vector.shape_cast %23 : vector<1x1x128xf32> to vector<1x128xf32>
    %25 = vector.shape_cast %22 : vector<1x128xf32> to vector<1x1x128xf32>
    tpu.vector_store %arg6[%c0_6, %c0_7, %c0_8], %25 {strides = array<i32>} : memref<6x1x128xf32, #tpu.memory_space<vmem>>, vector<1x1x128xf32>,
    %26 = vector.shape_cast %20 : vector<1x128xf32> to vector<1x1x128xf32>
    %27 = vector.extract_strided_slice %3 {offsets = [0, 0, 0], sizes = [1, 7, 128], strides = [1, 1, 1]} : vector<1x8x128xf32> to vector<1x7x128xf32>
    %28 = tpu.concatenate %26, %27 in 1 : vector<1x1x128xf32>, vector<1x7x128xf32> -> vector<1x8x128xf32>
    %cst = arith.constant 0.000000e+00 : f32
    %29 = vector.broadcast %cst : f32 to vector<1x8x128xf32>
    %c1_i32_9 = arith.constant 1 : i32
    %30 = tpu.dynamic_rotate %3 by %c1_i32_9 dim 2 : vector<1x8x128xf32>, i32 -> vector<1x8x128xf32>
    %c1_i32_10 = arith.constant 1 : i32
    %31 = tpu.dynamic_rotate %28 by %c1_i32_10 dim 2 : vector<1x8x128xf32>, i32 -> vector<1x8x128xf32>
    %32 = arith.select %6, %31, %30 : vector<1x8x128xi1>, vector<1x8x128xf32>
    %c0_11 = arith.constant 0 : index
    %c0_12 = arith.constant 0 : index
    %c0_13 = arith.constant 0 : index
    %c0_14 = arith.constant 0 : index
    %33 = vector.load %arg3[%c0_11, %c0_12, %c0_13, %c0_14] : memref<7x1x8x128xf32, #tpu.memory_space<vmem>>, vector<1x1x8x128xf32>
    %34 = vector.shape_cast %33 : vector<1x1x8x128xf32> to vector<1x8x128xf32>
    %35 = arith.mulf %32, %34 : vector<1x8x128xf32>
    %36 = arith.addf %29, %35 : vector<1x8x128xf32>
    %c2_i32_15 = arith.constant 2 : i32
    %37 = tpu.dynamic_rotate %3 by %c2_i32_15 dim 2 : vector<1x8x128xf32>, i32 -> vector<1x8x128xf32>
    %c2_i32_16 = arith.constant 2 : i32
    %38 = tpu.dynamic_rotate %28 by %c2_i32_16 dim 2 : vector<1x8x128xf32>, i32 -> vector<1x8x128xf32>
    %39 = arith.select %8, %38, %37 : vector<1x8x128xi1>, vector<1x8x128xf32>
    %c1 = arith.constant 1 : index
    %c0_17 = arith.constant 0 : index
    %c0_18 = arith.constant 0 : index
    %c0_19 = arith.constant 0 : index
    %40 = vector.load %arg3[%c1, %c0_17, %c0_18, %c0_19] : memref<7x1x8x128xf32, #tpu.memory_space<vmem>>, vector<1x1x8x128xf32>
    %41 = vector.shape_cast %40 : vector<1x1x8x128xf32> to vector<1x8x128xf32>
    %42 = arith.mulf %39, %41 : vector<1x8x128xf32>
    %43 = arith.addf %36, %42 : vector<1x8x128xf32>
    %c3_i32_20 = arith.constant 3 : i32
    %44 = tpu.dynamic_rotate %3 by %c3_i32_20 dim 2 : vector<1x8x128xf32>, i32 -> vector<1x8x128xf32>
    %c3_i32_21 = arith.constant 3 : i32
    %45 = tpu.dynamic_rotate %28 by %c3_i32_21 dim 2 : vector<1x8x128xf32>, i32 -> vector<1x8x128xf32>
    %46 = arith.select %10, %45, %44 : vector<1x8x128xi1>, vector<1x8x128xf32>
    %c2 = arith.constant 2 : index
    %c0_22 = arith.constant 0 : index
    %c0_23 = arith.constant 0 : index
    %c0_24 = arith.constant 0 : index
    %47 = vector.load %arg3[%c2, %c0_22, %c0_23, %c0_24] : memref<7x1x8x128xf32, #tpu.memory_space<vmem>>, vector<1x1x8x128xf32>
    %48 = vector.shape_cast %47 : vector<1x1x8x128xf32> to vector<1x8x128xf32>
    %49 = arith.mulf %46, %48 : vector<1x8x128xf32>
    %50 = arith.addf %43, %49 : vector<1x8x128xf32>
    %c4_i32_25 = arith.constant 4 : i32
    %51 = tpu.dynamic_rotate %3 by %c4_i32_25 dim 2 : vector<1x8x128xf32>, i32 -> vector<1x8x128xf32>
    %c4_i32_26 = arith.constant 4 : i32
    %52 = tpu.dynamic_rotate %28 by %c4_i32_26 dim 2 : vector<1x8x128xf32>, i32 -> vector<1x8x128xf32>
    %53 = arith.select %12, %52, %51 : vector<1x8x128xi1>, vector<1x8x128xf32>
    %c3 = arith.constant 3 : index
    %c0_27 = arith.constant 0 : index
    %c0_28 = arith.constant 0 : index
    %c0_29 = arith.constant 0 : index
    %54 = vector.load %arg3[%c3, %c0_27, %c0_28, %c0_29] : memref<7x1x8x128xf32, #tpu.memory_space<vmem>>, vector<1x1x8x128xf32>
    %55 = vector.shape_cast %54 : vector<1x1x8x128xf32> to vector<1x8x128xf32>
    %56 = arith.mulf %53, %55 : vector<1x8x128xf32>
    %57 = arith.addf %50, %56 : vector<1x8x128xf32>
    %c5_i32_30 = arith.constant 5 : i32
    %58 = tpu.dynamic_rotate %3 by %c5_i32_30 dim 2 : vector<1x8x128xf32>, i32 -> vector<1x8x128xf32>
    %c5_i32_31 = arith.constant 5 : i32
    %59 = tpu.dynamic_rotate %28 by %c5_i32_31 dim 2 : vector<1x8x128xf32>, i32 -> vector<1x8x128xf32>
    %60 = arith.select %14, %59, %58 : vector<1x8x128xi1>, vector<1x8x128xf32>
    %c4 = arith.constant 4 : index
    %c0_32 = arith.constant 0 : index
    %c0_33 = arith.constant 0 : index
    %c0_34 = arith.constant 0 : index
    %61 = vector.load %arg3[%c4, %c0_32, %c0_33, %c0_34] : memref<7x1x8x128xf32, #tpu.memory_space<vmem>>, vector<1x1x8x128xf32>
    %62 = vector.shape_cast %61 : vector<1x1x8x128xf32> to vector<1x8x128xf32>
    %63 = arith.mulf %60, %62 : vector<1x8x128xf32>
    %64 = arith.addf %57, %63 : vector<1x8x128xf32>
    %c6_i32_35 = arith.constant 6 : i32
    %65 = tpu.dynamic_rotate %3 by %c6_i32_35 dim 2 : vector<1x8x128xf32>, i32 -> vector<1x8x128xf32>
    %c6_i32_36 = arith.constant 6 : i32
    %66 = tpu.dynamic_rotate %28 by %c6_i32_36 dim 2 : vector<1x8x128xf32>, i32 -> vector<1x8x128xf32>
    %67 = arith.select %16, %66, %65 : vector<1x8x128xi1>, vector<1x8x128xf32>
    %c5 = arith.constant 5 : index
    %c0_37 = arith.constant 0 : index
    %c0_38 = arith.constant 0 : index
    %c0_39 = arith.constant 0 : index
    %68 = vector.load %arg3[%c5, %c0_37, %c0_38, %c0_39] : memref<7x1x8x128xf32, #tpu.memory_space<vmem>>, vector<1x1x8x128xf32>
    %69 = vector.shape_cast %68 : vector<1x1x8x128xf32> to vector<1x8x128xf32>
    %70 = arith.mulf %67, %69 : vector<1x8x128xf32>
    %71 = arith.addf %64, %70 : vector<1x8x128xf32>
    %c7_i32_40 = arith.constant 7 : i32
    %72 = tpu.dynamic_rotate %3 by %c7_i32_40 dim 2 : vector<1x8x128xf32>, i32 -> vector<1x8x128xf32>
    %c7_i32_41 = arith.constant 7 : i32
    %73 = tpu.dynamic_rotate %28 by %c7_i32_41 dim 2 : vector<1x8x128xf32>, i32 -> vector<1x8x128xf32>
    %74 = arith.select %18, %73, %72 : vector<1x8x128xi1>, vector<1x8x128xf32>
    %c6 = arith.constant 6 : index
    %c0_42 = arith.constant 0 : index
    %c0_43 = arith.constant 0 : index
    %c0_44 = arith.constant 0 : index
    %75 = vector.load %arg3[%c6, %c0_42, %c0_43, %c0_44] : memref<7x1x8x128xf32, #tpu.memory_space<vmem>>, vector<1x1x8x128xf32>
    %76 = vector.shape_cast %75 : vector<1x1x8x128xf32> to vector<1x8x128xf32>
    %77 = arith.mulf %74, %76 : vector<1x8x128xf32>
    %78 = arith.addf %71, %77 : vector<1x8x128xf32>
    %cst_45 = arith.constant 1.000000e+00 : f32
    %79 = vector.broadcast %cst_45 : f32 to vector<1x8x128xf32>
    %80 = arith.mulf %78, %79 : vector<1x8x128xf32>
    %81 = arith.addf %3, %80 : vector<1x8x128xf32>
    %c1_46 = arith.constant 1 : index
    %c0_47 = arith.constant 0 : index
    %c0_48 = arith.constant 0 : index
    %82 = vector.load %arg6[%c1_46, %c0_47, %c0_48] : memref<6x1x128xf32, #tpu.memory_space<vmem>>, vector<1x1x128xf32>
    %83 = vector.shape_cast %82 : vector<1x1x128xf32> to vector<1x128xf32>
    %84 = vector.extract_strided_slice %80 {offsets = [0, 7, 0], sizes = [1, 1, 128], strides = [1, 1, 1]} : vector<1x8x128xf32> to vector<1x1x128xf32>
    %85 = vector.shape_cast %84 : vector<1x1x128xf32> to vector<1x128xf32>
    %c1_49 = arith.constant 1 : index
    %c0_50 = arith.constant 0 : index
    %c0_51 = arith.constant 0 : index
    %86 = vector.load %arg6[%c1_49, %c0_50, %c0_51] : memref<6x1x128xf32, #tpu.memory_space<vmem>>, vector<1x1x128xf32>
    %87 = vector.shape_cast %86 : vector<1x1x128xf32> to vector<1x128xf32>
    %88 = vector.shape_cast %85 : vector<1x128xf32> to vector<1x1x128xf32>
    tpu.vector_store %arg6[%c1_49, %c0_50, %c0_51], %88 {strides = array<i32>} : memref<6x1x128xf32, #tpu.memory_space<vmem>>, vector<1x1x128xf32>,
    %89 = vector.shape_cast %83 : vector<1x128xf32> to vector<1x1x128xf32>
    %90 = vector.extract_strided_slice %80 {offsets = [0, 0, 0], sizes = [1, 7, 128], strides = [1, 1, 1]} : vector<1x8x128xf32> to vector<1x7x128xf32>
    %91 = tpu.concatenate %89, %90 in 1 : vector<1x1x128xf32>, vector<1x7x128xf32> -> vector<1x8x128xf32>
    %cst_52 = arith.constant 0.000000e+00 : f32
    %92 = vector.broadcast %cst_52 : f32 to vector<1x8x128xf32>
    %c1_i32_53 = arith.constant 1 : i32
    %93 = tpu.dynamic_rotate %80 by %c1_i32_53 dim 2 : vector<1x8x128xf32>, i32 -> vector<1x8x128xf32>
    %c1_i32_54 = arith.constant 1 : i32
    %94 = tpu.dynamic_rotate %91 by %c1_i32_54 dim 2 : vector<1x8x128xf32>, i32 -> vector<1x8x128xf32>
    %95 = arith.select %6, %94, %93 : vector<1x8x128xi1>, vector<1x8x128xf32>
    %c0_55 = arith.constant 0 : index
    %c0_56 = arith.constant 0 : index
    %c0_57 = arith.constant 0 : index
    %c0_58 = arith.constant 0 : index
    %96 = vector.load %arg3[%c0_55, %c0_56, %c0_57, %c0_58] : memref<7x1x8x128xf32, #tpu.memory_space<vmem>>, vector<1x1x8x128xf32>
    %97 = vector.shape_cast %96 : vector<1x1x8x128xf32> to vector<1x8x128xf32>
    %98 = arith.mulf %95, %97 : vector<1x8x128xf32>
    %99 = arith.addf %92, %98 : vector<1x8x128xf32>
    %c2_i32_59 = arith.constant 2 : i32
    %100 = tpu.dynamic_rotate %80 by %c2_i32_59 dim 2 : vector<1x8x128xf32>, i32 -> vector<1x8x128xf32>
    %c2_i32_60 = arith.constant 2 : i32
    %101 = tpu.dynamic_rotate %91 by %c2_i32_60 dim 2 : vector<1x8x128xf32>, i32 -> vector<1x8x128xf32>
    %102 = arith.select %8, %101, %100 : vector<1x8x128xi1>, vector<1x8x128xf32>
    %c1_61 = arith.constant 1 : index
    %c0_62 = arith.constant 0 : index
    %c0_63 = arith.constant 0 : index
    %c0_64 = arith.constant 0 : index
    %103 = vector.load %arg3[%c1_61, %c0_62, %c0_63, %c0_64] : memref<7x1x8x128xf32, #tpu.memory_space<vmem>>, vector<1x1x8x128xf32>
    %104 = vector.shape_cast %103 : vector<1x1x8x128xf32> to vector<1x8x128xf32>
    %105 = arith.mulf %102, %104 : vector<1x8x128xf32>
    %106 = arith.addf %99, %105 : vector<1x8x128xf32>
    %c3_i32_65 = arith.constant 3 : i32
    %107 = tpu.dynamic_rotate %80 by %c3_i32_65 dim 2 : vector<1x8x128xf32>, i32 -> vector<1x8x128xf32>
    %c3_i32_66 = arith.constant 3 : i32
    %108 = tpu.dynamic_rotate %91 by %c3_i32_66 dim 2 : vector<1x8x128xf32>, i32 -> vector<1x8x128xf32>
    %109 = arith.select %10, %108, %107 : vector<1x8x128xi1>, vector<1x8x128xf32>
    %c2_67 = arith.constant 2 : index
    %c0_68 = arith.constant 0 : index
    %c0_69 = arith.constant 0 : index
    %c0_70 = arith.constant 0 : index
    %110 = vector.load %arg3[%c2_67, %c0_68, %c0_69, %c0_70] : memref<7x1x8x128xf32, #tpu.memory_space<vmem>>, vector<1x1x8x128xf32>
    %111 = vector.shape_cast %110 : vector<1x1x8x128xf32> to vector<1x8x128xf32>
    %112 = arith.mulf %109, %111 : vector<1x8x128xf32>
    %113 = arith.addf %106, %112 : vector<1x8x128xf32>
    %c4_i32_71 = arith.constant 4 : i32
    %114 = tpu.dynamic_rotate %80 by %c4_i32_71 dim 2 : vector<1x8x128xf32>, i32 -> vector<1x8x128xf32>
    %c4_i32_72 = arith.constant 4 : i32
    %115 = tpu.dynamic_rotate %91 by %c4_i32_72 dim 2 : vector<1x8x128xf32>, i32 -> vector<1x8x128xf32>
    %116 = arith.select %12, %115, %114 : vector<1x8x128xi1>, vector<1x8x128xf32>
    %c3_73 = arith.constant 3 : index
    %c0_74 = arith.constant 0 : index
    %c0_75 = arith.constant 0 : index
    %c0_76 = arith.constant 0 : index
    %117 = vector.load %arg3[%c3_73, %c0_74, %c0_75, %c0_76] : memref<7x1x8x128xf32, #tpu.memory_space<vmem>>, vector<1x1x8x128xf32>
    %118 = vector.shape_cast %117 : vector<1x1x8x128xf32> to vector<1x8x128xf32>
    %119 = arith.mulf %116, %118 : vector<1x8x128xf32>
    %120 = arith.addf %113, %119 : vector<1x8x128xf32>
    %c5_i32_77 = arith.constant 5 : i32
    %121 = tpu.dynamic_rotate %80 by %c5_i32_77 dim 2 : vector<1x8x128xf32>, i32 -> vector<1x8x128xf32>
    %c5_i32_78 = arith.constant 5 : i32
    %122 = tpu.dynamic_rotate %91 by %c5_i32_78 dim 2 : vector<1x8x128xf32>, i32 -> vector<1x8x128xf32>
    %123 = arith.select %14, %122, %121 : vector<1x8x128xi1>, vector<1x8x128xf32>
    %c4_79 = arith.constant 4 : index
    %c0_80 = arith.constant 0 : index
    %c0_81 = arith.constant 0 : index
    %c0_82 = arith.constant 0 : index
    %124 = vector.load %arg3[%c4_79, %c0_80, %c0_81, %c0_82] : memref<7x1x8x128xf32, #tpu.memory_space<vmem>>, vector<1x1x8x128xf32>
    %125 = vector.shape_cast %124 : vector<1x1x8x128xf32> to vector<1x8x128xf32>
    %126 = arith.mulf %123, %125 : vector<1x8x128xf32>
    %127 = arith.addf %120, %126 : vector<1x8x128xf32>
    %c6_i32_83 = arith.constant 6 : i32
    %128 = tpu.dynamic_rotate %80 by %c6_i32_83 dim 2 : vector<1x8x128xf32>, i32 -> vector<1x8x128xf32>
    %c6_i32_84 = arith.constant 6 : i32
    %129 = tpu.dynamic_rotate %91 by %c6_i32_84 dim 2 : vector<1x8x128xf32>, i32 -> vector<1x8x128xf32>
    %130 = arith.select %16, %129, %128 : vector<1x8x128xi1>, vector<1x8x128xf32>
    %c5_85 = arith.constant 5 : index
    %c0_86 = arith.constant 0 : index
    %c0_87 = arith.constant 0 : index
    %c0_88 = arith.constant 0 : index
    %131 = vector.load %arg3[%c5_85, %c0_86, %c0_87, %c0_88] : memref<7x1x8x128xf32, #tpu.memory_space<vmem>>, vector<1x1x8x128xf32>
    %132 = vector.shape_cast %131 : vector<1x1x8x128xf32> to vector<1x8x128xf32>
    %133 = arith.mulf %130, %132 : vector<1x8x128xf32>
    %134 = arith.addf %127, %133 : vector<1x8x128xf32>
    %c7_i32_89 = arith.constant 7 : i32
    %135 = tpu.dynamic_rotate %80 by %c7_i32_89 dim 2 : vector<1x8x128xf32>, i32 -> vector<1x8x128xf32>
    %c7_i32_90 = arith.constant 7 : i32
    %136 = tpu.dynamic_rotate %91 by %c7_i32_90 dim 2 : vector<1x8x128xf32>, i32 -> vector<1x8x128xf32>
    %137 = arith.select %18, %136, %135 : vector<1x8x128xi1>, vector<1x8x128xf32>
    %c6_91 = arith.constant 6 : index
    %c0_92 = arith.constant 0 : index
    %c0_93 = arith.constant 0 : index
    %c0_94 = arith.constant 0 : index
    %138 = vector.load %arg3[%c6_91, %c0_92, %c0_93, %c0_94] : memref<7x1x8x128xf32, #tpu.memory_space<vmem>>, vector<1x1x8x128xf32>
    %139 = vector.shape_cast %138 : vector<1x1x8x128xf32> to vector<1x8x128xf32>
    %140 = arith.mulf %137, %139 : vector<1x8x128xf32>
    %141 = arith.addf %134, %140 : vector<1x8x128xf32>
    %cst_95 = arith.constant 5.000000e-01 : f32
    %142 = vector.broadcast %cst_95 : f32 to vector<1x8x128xf32>
    %143 = arith.mulf %141, %142 : vector<1x8x128xf32>
    %144 = arith.addf %81, %143 : vector<1x8x128xf32>
    %c2_96 = arith.constant 2 : index
    %c0_97 = arith.constant 0 : index
    %c0_98 = arith.constant 0 : index
    %145 = vector.load %arg6[%c2_96, %c0_97, %c0_98] : memref<6x1x128xf32, #tpu.memory_space<vmem>>, vector<1x1x128xf32>
    %146 = vector.shape_cast %145 : vector<1x1x128xf32> to vector<1x128xf32>
    %147 = vector.extract_strided_slice %143 {offsets = [0, 7, 0], sizes = [1, 1, 128], strides = [1, 1, 1]} : vector<1x8x128xf32> to vector<1x1x128xf32>
    %148 = vector.shape_cast %147 : vector<1x1x128xf32> to vector<1x128xf32>
    %c2_99 = arith.constant 2 : index
    %c0_100 = arith.constant 0 : index
    %c0_101 = arith.constant 0 : index
    %149 = vector.load %arg6[%c2_99, %c0_100, %c0_101] : memref<6x1x128xf32, #tpu.memory_space<vmem>>, vector<1x1x128xf32>
    %150 = vector.shape_cast %149 : vector<1x1x128xf32> to vector<1x128xf32>
    %151 = vector.shape_cast %148 : vector<1x128xf32> to vector<1x1x128xf32>
    tpu.vector_store %arg6[%c2_99, %c0_100, %c0_101], %151 {strides = array<i32>} : memref<6x1x128xf32, #tpu.memory_space<vmem>>, vector<1x1x128xf32>,
    %152 = vector.shape_cast %146 : vector<1x128xf32> to vector<1x1x128xf32>
    %153 = vector.extract_strided_slice %143 {offsets = [0, 0, 0], sizes = [1, 7, 128], strides = [1, 1, 1]} : vector<1x8x128xf32> to vector<1x7x128xf32>
    %154 = tpu.concatenate %152, %153 in 1 : vector<1x1x128xf32>, vector<1x7x128xf32> -> vector<1x8x128xf32>
    %cst_102 = arith.constant 0.000000e+00 : f32
    %155 = vector.broadcast %cst_102 : f32 to vector<1x8x128xf32>
    %c1_i32_103 = arith.constant 1 : i32
    %156 = tpu.dynamic_rotate %143 by %c1_i32_103 dim 2 : vector<1x8x128xf32>, i32 -> vector<1x8x128xf32>
    %c1_i32_104 = arith.constant 1 : i32
    %157 = tpu.dynamic_rotate %154 by %c1_i32_104 dim 2 : vector<1x8x128xf32>, i32 -> vector<1x8x128xf32>
    %158 = arith.select %6, %157, %156 : vector<1x8x128xi1>, vector<1x8x128xf32>
    %c0_105 = arith.constant 0 : index
    %c0_106 = arith.constant 0 : index
    %c0_107 = arith.constant 0 : index
    %c0_108 = arith.constant 0 : index
    %159 = vector.load %arg3[%c0_105, %c0_106, %c0_107, %c0_108] : memref<7x1x8x128xf32, #tpu.memory_space<vmem>>, vector<1x1x8x128xf32>
    %160 = vector.shape_cast %159 : vector<1x1x8x128xf32> to vector<1x8x128xf32>
    %161 = arith.mulf %158, %160 : vector<1x8x128xf32>
    %162 = arith.addf %155, %161 : vector<1x8x128xf32>
    %c2_i32_109 = arith.constant 2 : i32
    %163 = tpu.dynamic_rotate %143 by %c2_i32_109 dim 2 : vector<1x8x128xf32>, i32 -> vector<1x8x128xf32>
    %c2_i32_110 = arith.constant 2 : i32
    %164 = tpu.dynamic_rotate %154 by %c2_i32_110 dim 2 : vector<1x8x128xf32>, i32 -> vector<1x8x128xf32>
    %165 = arith.select %8, %164, %163 : vector<1x8x128xi1>, vector<1x8x128xf32>
    %c1_111 = arith.constant 1 : index
    %c0_112 = arith.constant 0 : index
    %c0_113 = arith.constant 0 : index
    %c0_114 = arith.constant 0 : index
    %166 = vector.load %arg3[%c1_111, %c0_112, %c0_113, %c0_114] : memref<7x1x8x128xf32, #tpu.memory_space<vmem>>, vector<1x1x8x128xf32>
    %167 = vector.shape_cast %166 : vector<1x1x8x128xf32> to vector<1x8x128xf32>
    %168 = arith.mulf %165, %167 : vector<1x8x128xf32>
    %169 = arith.addf %162, %168 : vector<1x8x128xf32>
    %c3_i32_115 = arith.constant 3 : i32
    %170 = tpu.dynamic_rotate %143 by %c3_i32_115 dim 2 : vector<1x8x128xf32>, i32 -> vector<1x8x128xf32>
    %c3_i32_116 = arith.constant 3 : i32
    %171 = tpu.dynamic_rotate %154 by %c3_i32_116 dim 2 : vector<1x8x128xf32>, i32 -> vector<1x8x128xf32>
    %172 = arith.select %10, %171, %170 : vector<1x8x128xi1>, vector<1x8x128xf32>
    %c2_117 = arith.constant 2 : index
    %c0_118 = arith.constant 0 : index
    %c0_119 = arith.constant 0 : index
    %c0_120 = arith.constant 0 : index
    %173 = vector.load %arg3[%c2_117, %c0_118, %c0_119, %c0_120] : memref<7x1x8x128xf32, #tpu.memory_space<vmem>>, vector<1x1x8x128xf32>
    %174 = vector.shape_cast %173 : vector<1x1x8x128xf32> to vector<1x8x128xf32>
    %175 = arith.mulf %172, %174 : vector<1x8x128xf32>
    %176 = arith.addf %169, %175 : vector<1x8x128xf32>
    %c4_i32_121 = arith.constant 4 : i32
    %177 = tpu.dynamic_rotate %143 by %c4_i32_121 dim 2 : vector<1x8x128xf32>, i32 -> vector<1x8x128xf32>
    %c4_i32_122 = arith.constant 4 : i32
    %178 = tpu.dynamic_rotate %154 by %c4_i32_122 dim 2 : vector<1x8x128xf32>, i32 -> vector<1x8x128xf32>
    %179 = arith.select %12, %178, %177 : vector<1x8x128xi1>, vector<1x8x128xf32>
    %c3_123 = arith.constant 3 : index
    %c0_124 = arith.constant 0 : index
    %c0_125 = arith.constant 0 : index
    %c0_126 = arith.constant 0 : index
    %180 = vector.load %arg3[%c3_123, %c0_124, %c0_125, %c0_126] : memref<7x1x8x128xf32, #tpu.memory_space<vmem>>, vector<1x1x8x128xf32>
    %181 = vector.shape_cast %180 : vector<1x1x8x128xf32> to vector<1x8x128xf32>
    %182 = arith.mulf %179, %181 : vector<1x8x128xf32>
    %183 = arith.addf %176, %182 : vector<1x8x128xf32>
    %c5_i32_127 = arith.constant 5 : i32
    %184 = tpu.dynamic_rotate %143 by %c5_i32_127 dim 2 : vector<1x8x128xf32>, i32 -> vector<1x8x128xf32>
    %c5_i32_128 = arith.constant 5 : i32
    %185 = tpu.dynamic_rotate %154 by %c5_i32_128 dim 2 : vector<1x8x128xf32>, i32 -> vector<1x8x128xf32>
    %186 = arith.select %14, %185, %184 : vector<1x8x128xi1>, vector<1x8x128xf32>
    %c4_129 = arith.constant 4 : index
    %c0_130 = arith.constant 0 : index
    %c0_131 = arith.constant 0 : index
    %c0_132 = arith.constant 0 : index
    %187 = vector.load %arg3[%c4_129, %c0_130, %c0_131, %c0_132] : memref<7x1x8x128xf32, #tpu.memory_space<vmem>>, vector<1x1x8x128xf32>
    %188 = vector.shape_cast %187 : vector<1x1x8x128xf32> to vector<1x8x128xf32>
    %189 = arith.mulf %186, %188 : vector<1x8x128xf32>
    %190 = arith.addf %183, %189 : vector<1x8x128xf32>
    %c6_i32_133 = arith.constant 6 : i32
    %191 = tpu.dynamic_rotate %143 by %c6_i32_133 dim 2 : vector<1x8x128xf32>, i32 -> vector<1x8x128xf32>
    %c6_i32_134 = arith.constant 6 : i32
    %192 = tpu.dynamic_rotate %154 by %c6_i32_134 dim 2 : vector<1x8x128xf32>, i32 -> vector<1x8x128xf32>
    %193 = arith.select %16, %192, %191 : vector<1x8x128xi1>, vector<1x8x128xf32>
    %c5_135 = arith.constant 5 : index
    %c0_136 = arith.constant 0 : index
    %c0_137 = arith.constant 0 : index
    %c0_138 = arith.constant 0 : index
    %194 = vector.load %arg3[%c5_135, %c0_136, %c0_137, %c0_138] : memref<7x1x8x128xf32, #tpu.memory_space<vmem>>, vector<1x1x8x128xf32>
    %195 = vector.shape_cast %194 : vector<1x1x8x128xf32> to vector<1x8x128xf32>
    %196 = arith.mulf %193, %195 : vector<1x8x128xf32>
    %197 = arith.addf %190, %196 : vector<1x8x128xf32>
    %c7_i32_139 = arith.constant 7 : i32
    %198 = tpu.dynamic_rotate %143 by %c7_i32_139 dim 2 : vector<1x8x128xf32>, i32 -> vector<1x8x128xf32>
    %c7_i32_140 = arith.constant 7 : i32
    %199 = tpu.dynamic_rotate %154 by %c7_i32_140 dim 2 : vector<1x8x128xf32>, i32 -> vector<1x8x128xf32>
    %200 = arith.select %18, %199, %198 : vector<1x8x128xi1>, vector<1x8x128xf32>
    %c6_141 = arith.constant 6 : index
    %c0_142 = arith.constant 0 : index
    %c0_143 = arith.constant 0 : index
    %c0_144 = arith.constant 0 : index
    %201 = vector.load %arg3[%c6_141, %c0_142, %c0_143, %c0_144] : memref<7x1x8x128xf32, #tpu.memory_space<vmem>>, vector<1x1x8x128xf32>
    %202 = vector.shape_cast %201 : vector<1x1x8x128xf32> to vector<1x8x128xf32>
    %203 = arith.mulf %200, %202 : vector<1x8x128xf32>
    %204 = arith.addf %197, %203 : vector<1x8x128xf32>
    %cst_145 = arith.constant 0.333333343 : f32
    %205 = vector.broadcast %cst_145 : f32 to vector<1x8x128xf32>
    %206 = arith.mulf %204, %205 : vector<1x8x128xf32>
    %207 = arith.addf %144, %206 : vector<1x8x128xf32>
    %c3_146 = arith.constant 3 : index
    %c0_147 = arith.constant 0 : index
    %c0_148 = arith.constant 0 : index
    %208 = vector.load %arg6[%c3_146, %c0_147, %c0_148] : memref<6x1x128xf32, #tpu.memory_space<vmem>>, vector<1x1x128xf32>
    %209 = vector.shape_cast %208 : vector<1x1x128xf32> to vector<1x128xf32>
    %210 = vector.extract_strided_slice %206 {offsets = [0, 7, 0], sizes = [1, 1, 128], strides = [1, 1, 1]} : vector<1x8x128xf32> to vector<1x1x128xf32>
    %211 = vector.shape_cast %210 : vector<1x1x128xf32> to vector<1x128xf32>
    %c3_149 = arith.constant 3 : index
    %c0_150 = arith.constant 0 : index
    %c0_151 = arith.constant 0 : index
    %212 = vector.load %arg6[%c3_149, %c0_150, %c0_151] : memref<6x1x128xf32, #tpu.memory_space<vmem>>, vector<1x1x128xf32>
    %213 = vector.shape_cast %212 : vector<1x1x128xf32> to vector<1x128xf32>
    %214 = vector.shape_cast %211 : vector<1x128xf32> to vector<1x1x128xf32>
    tpu.vector_store %arg6[%c3_149, %c0_150, %c0_151], %214 {strides = array<i32>} : memref<6x1x128xf32, #tpu.memory_space<vmem>>, vector<1x1x128xf32>,
    %215 = vector.shape_cast %209 : vector<1x128xf32> to vector<1x1x128xf32>
    %216 = vector.extract_strided_slice %206 {offsets = [0, 0, 0], sizes = [1, 7, 128], strides = [1, 1, 1]} : vector<1x8x128xf32> to vector<1x7x128xf32>
    %217 = tpu.concatenate %215, %216 in 1 : vector<1x1x128xf32>, vector<1x7x128xf32> -> vector<1x8x128xf32>
    %cst_152 = arith.constant 0.000000e+00 : f32
    %218 = vector.broadcast %cst_152 : f32 to vector<1x8x128xf32>
    %c1_i32_153 = arith.constant 1 : i32
    %219 = tpu.dynamic_rotate %206 by %c1_i32_153 dim 2 : vector<1x8x128xf32>, i32 -> vector<1x8x128xf32>
    %c1_i32_154 = arith.constant 1 : i32
    %220 = tpu.dynamic_rotate %217 by %c1_i32_154 dim 2 : vector<1x8x128xf32>, i32 -> vector<1x8x128xf32>
    %221 = arith.select %6, %220, %219 : vector<1x8x128xi1>, vector<1x8x128xf32>
    %c0_155 = arith.constant 0 : index
    %c0_156 = arith.constant 0 : index
    %c0_157 = arith.constant 0 : index
    %c0_158 = arith.constant 0 : index
    %222 = vector.load %arg3[%c0_155, %c0_156, %c0_157, %c0_158] : memref<7x1x8x128xf32, #tpu.memory_space<vmem>>, vector<1x1x8x128xf32>
    %223 = vector.shape_cast %222 : vector<1x1x8x128xf32> to vector<1x8x128xf32>
    %224 = arith.mulf %221, %223 : vector<1x8x128xf32>
    %225 = arith.addf %218, %224 : vector<1x8x128xf32>
    %c2_i32_159 = arith.constant 2 : i32
    %226 = tpu.dynamic_rotate %206 by %c2_i32_159 dim 2 : vector<1x8x128xf32>, i32 -> vector<1x8x128xf32>
    %c2_i32_160 = arith.constant 2 : i32
    %227 = tpu.dynamic_rotate %217 by %c2_i32_160 dim 2 : vector<1x8x128xf32>, i32 -> vector<1x8x128xf32>
    %228 = arith.select %8, %227, %226 : vector<1x8x128xi1>, vector<1x8x128xf32>
    %c1_161 = arith.constant 1 : index
    %c0_162 = arith.constant 0 : index
    %c0_163 = arith.constant 0 : index
    %c0_164 = arith.constant 0 : index
    %229 = vector.load %arg3[%c1_161, %c0_162, %c0_163, %c0_164] : memref<7x1x8x128xf32, #tpu.memory_space<vmem>>, vector<1x1x8x128xf32>
    %230 = vector.shape_cast %229 : vector<1x1x8x128xf32> to vector<1x8x128xf32>
    %231 = arith.mulf %228, %230 : vector<1x8x128xf32>
    %232 = arith.addf %225, %231 : vector<1x8x128xf32>
    %c3_i32_165 = arith.constant 3 : i32
    %233 = tpu.dynamic_rotate %206 by %c3_i32_165 dim 2 : vector<1x8x128xf32>, i32 -> vector<1x8x128xf32>
    %c3_i32_166 = arith.constant 3 : i32
    %234 = tpu.dynamic_rotate %217 by %c3_i32_166 dim 2 : vector<1x8x128xf32>, i32 -> vector<1x8x128xf32>
    %235 = arith.select %10, %234, %233 : vector<1x8x128xi1>, vector<1x8x128xf32>
    %c2_167 = arith.constant 2 : index
    %c0_168 = arith.constant 0 : index
    %c0_169 = arith.constant 0 : index
    %c0_170 = arith.constant 0 : index
    %236 = vector.load %arg3[%c2_167, %c0_168, %c0_169, %c0_170] : memref<7x1x8x128xf32, #tpu.memory_space<vmem>>, vector<1x1x8x128xf32>
    %237 = vector.shape_cast %236 : vector<1x1x8x128xf32> to vector<1x8x128xf32>
    %238 = arith.mulf %235, %237 : vector<1x8x128xf32>
    %239 = arith.addf %232, %238 : vector<1x8x128xf32>
    %c4_i32_171 = arith.constant 4 : i32
    %240 = tpu.dynamic_rotate %206 by %c4_i32_171 dim 2 : vector<1x8x128xf32>, i32 -> vector<1x8x128xf32>
    %c4_i32_172 = arith.constant 4 : i32
    %241 = tpu.dynamic_rotate %217 by %c4_i32_172 dim 2 : vector<1x8x128xf32>, i32 -> vector<1x8x128xf32>
    %242 = arith.select %12, %241, %240 : vector<1x8x128xi1>, vector<1x8x128xf32>
    %c3_173 = arith.constant 3 : index
    %c0_174 = arith.constant 0 : index
    %c0_175 = arith.constant 0 : index
    %c0_176 = arith.constant 0 : index
    %243 = vector.load %arg3[%c3_173, %c0_174, %c0_175, %c0_176] : memref<7x1x8x128xf32, #tpu.memory_space<vmem>>, vector<1x1x8x128xf32>
    %244 = vector.shape_cast %243 : vector<1x1x8x128xf32> to vector<1x8x128xf32>
    %245 = arith.mulf %242, %244 : vector<1x8x128xf32>
    %246 = arith.addf %239, %245 : vector<1x8x128xf32>
    %c5_i32_177 = arith.constant 5 : i32
    %247 = tpu.dynamic_rotate %206 by %c5_i32_177 dim 2 : vector<1x8x128xf32>, i32 -> vector<1x8x128xf32>
    %c5_i32_178 = arith.constant 5 : i32
    %248 = tpu.dynamic_rotate %217 by %c5_i32_178 dim 2 : vector<1x8x128xf32>, i32 -> vector<1x8x128xf32>
    %249 = arith.select %14, %248, %247 : vector<1x8x128xi1>, vector<1x8x128xf32>
    %c4_179 = arith.constant 4 : index
    %c0_180 = arith.constant 0 : index
    %c0_181 = arith.constant 0 : index
    %c0_182 = arith.constant 0 : index
    %250 = vector.load %arg3[%c4_179, %c0_180, %c0_181, %c0_182] : memref<7x1x8x128xf32, #tpu.memory_space<vmem>>, vector<1x1x8x128xf32>
    %251 = vector.shape_cast %250 : vector<1x1x8x128xf32> to vector<1x8x128xf32>
    %252 = arith.mulf %249, %251 : vector<1x8x128xf32>
    %253 = arith.addf %246, %252 : vector<1x8x128xf32>
    %c6_i32_183 = arith.constant 6 : i32
    %254 = tpu.dynamic_rotate %206 by %c6_i32_183 dim 2 : vector<1x8x128xf32>, i32 -> vector<1x8x128xf32>
    %c6_i32_184 = arith.constant 6 : i32
    %255 = tpu.dynamic_rotate %217 by %c6_i32_184 dim 2 : vector<1x8x128xf32>, i32 -> vector<1x8x128xf32>
    %256 = arith.select %16, %255, %254 : vector<1x8x128xi1>, vector<1x8x128xf32>
    %c5_185 = arith.constant 5 : index
    %c0_186 = arith.constant 0 : index
    %c0_187 = arith.constant 0 : index
    %c0_188 = arith.constant 0 : index
    %257 = vector.load %arg3[%c5_185, %c0_186, %c0_187, %c0_188] : memref<7x1x8x128xf32, #tpu.memory_space<vmem>>, vector<1x1x8x128xf32>
    %258 = vector.shape_cast %257 : vector<1x1x8x128xf32> to vector<1x8x128xf32>
    %259 = arith.mulf %256, %258 : vector<1x8x128xf32>
    %260 = arith.addf %253, %259 : vector<1x8x128xf32>
    %c7_i32_189 = arith.constant 7 : i32
    %261 = tpu.dynamic_rotate %206 by %c7_i32_189 dim 2 : vector<1x8x128xf32>, i32 -> vector<1x8x128xf32>
    %c7_i32_190 = arith.constant 7 : i32
    %262 = tpu.dynamic_rotate %217 by %c7_i32_190 dim 2 : vector<1x8x128xf32>, i32 -> vector<1x8x128xf32>
    %263 = arith.select %18, %262, %261 : vector<1x8x128xi1>, vector<1x8x128xf32>
    %c6_191 = arith.constant 6 : index
    %c0_192 = arith.constant 0 : index
    %c0_193 = arith.constant 0 : index
    %c0_194 = arith.constant 0 : index
    %264 = vector.load %arg3[%c6_191, %c0_192, %c0_193, %c0_194] : memref<7x1x8x128xf32, #tpu.memory_space<vmem>>, vector<1x1x8x128xf32>
    %265 = vector.shape_cast %264 : vector<1x1x8x128xf32> to vector<1x8x128xf32>
    %266 = arith.mulf %263, %265 : vector<1x8x128xf32>
    %267 = arith.addf %260, %266 : vector<1x8x128xf32>
    %cst_195 = arith.constant 2.500000e-01 : f32
    %268 = vector.broadcast %cst_195 : f32 to vector<1x8x128xf32>
    %269 = arith.mulf %267, %268 : vector<1x8x128xf32>
    %270 = arith.addf %207, %269 : vector<1x8x128xf32>
    %c4_196 = arith.constant 4 : index
    %c0_197 = arith.constant 0 : index
    %c0_198 = arith.constant 0 : index
    %271 = vector.load %arg6[%c4_196, %c0_197, %c0_198] : memref<6x1x128xf32, #tpu.memory_space<vmem>>, vector<1x1x128xf32>
    %272 = vector.shape_cast %271 : vector<1x1x128xf32> to vector<1x128xf32>
    %273 = vector.extract_strided_slice %269 {offsets = [0, 7, 0], sizes = [1, 1, 128], strides = [1, 1, 1]} : vector<1x8x128xf32> to vector<1x1x128xf32>
    %274 = vector.shape_cast %273 : vector<1x1x128xf32> to vector<1x128xf32>
    %c4_199 = arith.constant 4 : index
    %c0_200 = arith.constant 0 : index
    %c0_201 = arith.constant 0 : index
    %275 = vector.load %arg6[%c4_199, %c0_200, %c0_201] : memref<6x1x128xf32, #tpu.memory_space<vmem>>, vector<1x1x128xf32>
    %276 = vector.shape_cast %275 : vector<1x1x128xf32> to vector<1x128xf32>
    %277 = vector.shape_cast %274 : vector<1x128xf32> to vector<1x1x128xf32>
    tpu.vector_store %arg6[%c4_199, %c0_200, %c0_201], %277 {strides = array<i32>} : memref<6x1x128xf32, #tpu.memory_space<vmem>>, vector<1x1x128xf32>,
    %278 = vector.shape_cast %272 : vector<1x128xf32> to vector<1x1x128xf32>
    %279 = vector.extract_strided_slice %269 {offsets = [0, 0, 0], sizes = [1, 7, 128], strides = [1, 1, 1]} : vector<1x8x128xf32> to vector<1x7x128xf32>
    %280 = tpu.concatenate %278, %279 in 1 : vector<1x1x128xf32>, vector<1x7x128xf32> -> vector<1x8x128xf32>
    %cst_202 = arith.constant 0.000000e+00 : f32
    %281 = vector.broadcast %cst_202 : f32 to vector<1x8x128xf32>
    %c1_i32_203 = arith.constant 1 : i32
    %282 = tpu.dynamic_rotate %269 by %c1_i32_203 dim 2 : vector<1x8x128xf32>, i32 -> vector<1x8x128xf32>
    %c1_i32_204 = arith.constant 1 : i32
    %283 = tpu.dynamic_rotate %280 by %c1_i32_204 dim 2 : vector<1x8x128xf32>, i32 -> vector<1x8x128xf32>
    %284 = arith.select %6, %283, %282 : vector<1x8x128xi1>, vector<1x8x128xf32>
    %c0_205 = arith.constant 0 : index
    %c0_206 = arith.constant 0 : index
    %c0_207 = arith.constant 0 : index
    %c0_208 = arith.constant 0 : index
    %285 = vector.load %arg3[%c0_205, %c0_206, %c0_207, %c0_208] : memref<7x1x8x128xf32, #tpu.memory_space<vmem>>, vector<1x1x8x128xf32>
    %286 = vector.shape_cast %285 : vector<1x1x8x128xf32> to vector<1x8x128xf32>
    %287 = arith.mulf %284, %286 : vector<1x8x128xf32>
    %288 = arith.addf %281, %287 : vector<1x8x128xf32>
    %c2_i32_209 = arith.constant 2 : i32
    %289 = tpu.dynamic_rotate %269 by %c2_i32_209 dim 2 : vector<1x8x128xf32>, i32 -> vector<1x8x128xf32>
    %c2_i32_210 = arith.constant 2 : i32
    %290 = tpu.dynamic_rotate %280 by %c2_i32_210 dim 2 : vector<1x8x128xf32>, i32 -> vector<1x8x128xf32>
    %291 = arith.select %8, %290, %289 : vector<1x8x128xi1>, vector<1x8x128xf32>
    %c1_211 = arith.constant 1 : index
    %c0_212 = arith.constant 0 : index
    %c0_213 = arith.constant 0 : index
    %c0_214 = arith.constant 0 : index
    %292 = vector.load %arg3[%c1_211, %c0_212, %c0_213, %c0_214] : memref<7x1x8x128xf32, #tpu.memory_space<vmem>>, vector<1x1x8x128xf32>
    %293 = vector.shape_cast %292 : vector<1x1x8x128xf32> to vector<1x8x128xf32>
    %294 = arith.mulf %291, %293 : vector<1x8x128xf32>
    %295 = arith.addf %288, %294 : vector<1x8x128xf32>
    %c3_i32_215 = arith.constant 3 : i32
    %296 = tpu.dynamic_rotate %269 by %c3_i32_215 dim 2 : vector<1x8x128xf32>, i32 -> vector<1x8x128xf32>
    %c3_i32_216 = arith.constant 3 : i32
    %297 = tpu.dynamic_rotate %280 by %c3_i32_216 dim 2 : vector<1x8x128xf32>, i32 -> vector<1x8x128xf32>
    %298 = arith.select %10, %297, %296 : vector<1x8x128xi1>, vector<1x8x128xf32>
    %c2_217 = arith.constant 2 : index
    %c0_218 = arith.constant 0 : index
    %c0_219 = arith.constant 0 : index
    %c0_220 = arith.constant 0 : index
    %299 = vector.load %arg3[%c2_217, %c0_218, %c0_219, %c0_220] : memref<7x1x8x128xf32, #tpu.memory_space<vmem>>, vector<1x1x8x128xf32>
    %300 = vector.shape_cast %299 : vector<1x1x8x128xf32> to vector<1x8x128xf32>
    %301 = arith.mulf %298, %300 : vector<1x8x128xf32>
    %302 = arith.addf %295, %301 : vector<1x8x128xf32>
    %c4_i32_221 = arith.constant 4 : i32
    %303 = tpu.dynamic_rotate %269 by %c4_i32_221 dim 2 : vector<1x8x128xf32>, i32 -> vector<1x8x128xf32>
    %c4_i32_222 = arith.constant 4 : i32
    %304 = tpu.dynamic_rotate %280 by %c4_i32_222 dim 2 : vector<1x8x128xf32>, i32 -> vector<1x8x128xf32>
    %305 = arith.select %12, %304, %303 : vector<1x8x128xi1>, vector<1x8x128xf32>
    %c3_223 = arith.constant 3 : index
    %c0_224 = arith.constant 0 : index
    %c0_225 = arith.constant 0 : index
    %c0_226 = arith.constant 0 : index
    %306 = vector.load %arg3[%c3_223, %c0_224, %c0_225, %c0_226] : memref<7x1x8x128xf32, #tpu.memory_space<vmem>>, vector<1x1x8x128xf32>
    %307 = vector.shape_cast %306 : vector<1x1x8x128xf32> to vector<1x8x128xf32>
    %308 = arith.mulf %305, %307 : vector<1x8x128xf32>
    %309 = arith.addf %302, %308 : vector<1x8x128xf32>
    %c5_i32_227 = arith.constant 5 : i32
    %310 = tpu.dynamic_rotate %269 by %c5_i32_227 dim 2 : vector<1x8x128xf32>, i32 -> vector<1x8x128xf32>
    %c5_i32_228 = arith.constant 5 : i32
    %311 = tpu.dynamic_rotate %280 by %c5_i32_228 dim 2 : vector<1x8x128xf32>, i32 -> vector<1x8x128xf32>
    %312 = arith.select %14, %311, %310 : vector<1x8x128xi1>, vector<1x8x128xf32>
    %c4_229 = arith.constant 4 : index
    %c0_230 = arith.constant 0 : index
    %c0_231 = arith.constant 0 : index
    %c0_232 = arith.constant 0 : index
    %313 = vector.load %arg3[%c4_229, %c0_230, %c0_231, %c0_232] : memref<7x1x8x128xf32, #tpu.memory_space<vmem>>, vector<1x1x8x128xf32>
    %314 = vector.shape_cast %313 : vector<1x1x8x128xf32> to vector<1x8x128xf32>
    %315 = arith.mulf %312, %314 : vector<1x8x128xf32>
    %316 = arith.addf %309, %315 : vector<1x8x128xf32>
    %c6_i32_233 = arith.constant 6 : i32
    %317 = tpu.dynamic_rotate %269 by %c6_i32_233 dim 2 : vector<1x8x128xf32>, i32 -> vector<1x8x128xf32>
    %c6_i32_234 = arith.constant 6 : i32
    %318 = tpu.dynamic_rotate %280 by %c6_i32_234 dim 2 : vector<1x8x128xf32>, i32 -> vector<1x8x128xf32>
    %319 = arith.select %16, %318, %317 : vector<1x8x128xi1>, vector<1x8x128xf32>
    %c5_235 = arith.constant 5 : index
    %c0_236 = arith.constant 0 : index
    %c0_237 = arith.constant 0 : index
    %c0_238 = arith.constant 0 : index
    %320 = vector.load %arg3[%c5_235, %c0_236, %c0_237, %c0_238] : memref<7x1x8x128xf32, #tpu.memory_space<vmem>>, vector<1x1x8x128xf32>
    %321 = vector.shape_cast %320 : vector<1x1x8x128xf32> to vector<1x8x128xf32>
    %322 = arith.mulf %319, %321 : vector<1x8x128xf32>
    %323 = arith.addf %316, %322 : vector<1x8x128xf32>
    %c7_i32_239 = arith.constant 7 : i32
    %324 = tpu.dynamic_rotate %269 by %c7_i32_239 dim 2 : vector<1x8x128xf32>, i32 -> vector<1x8x128xf32>
    %c7_i32_240 = arith.constant 7 : i32
    %325 = tpu.dynamic_rotate %280 by %c7_i32_240 dim 2 : vector<1x8x128xf32>, i32 -> vector<1x8x128xf32>
    %326 = arith.select %18, %325, %324 : vector<1x8x128xi1>, vector<1x8x128xf32>
    %c6_241 = arith.constant 6 : index
    %c0_242 = arith.constant 0 : index
    %c0_243 = arith.constant 0 : index
    %c0_244 = arith.constant 0 : index
    %327 = vector.load %arg3[%c6_241, %c0_242, %c0_243, %c0_244] : memref<7x1x8x128xf32, #tpu.memory_space<vmem>>, vector<1x1x8x128xf32>
    %328 = vector.shape_cast %327 : vector<1x1x8x128xf32> to vector<1x8x128xf32>
    %329 = arith.mulf %326, %328 : vector<1x8x128xf32>
    %330 = arith.addf %323, %329 : vector<1x8x128xf32>
    %cst_245 = arith.constant 2.000000e-01 : f32
    %331 = vector.broadcast %cst_245 : f32 to vector<1x8x128xf32>
    %332 = arith.mulf %330, %331 : vector<1x8x128xf32>
    %333 = arith.addf %270, %332 : vector<1x8x128xf32>
    %c5_246 = arith.constant 5 : index
    %c0_247 = arith.constant 0 : index
    %c0_248 = arith.constant 0 : index
    %334 = vector.load %arg6[%c5_246, %c0_247, %c0_248] : memref<6x1x128xf32, #tpu.memory_space<vmem>>, vector<1x1x128xf32>
    %335 = vector.shape_cast %334 : vector<1x1x128xf32> to vector<1x128xf32>
    %336 = vector.extract_strided_slice %332 {offsets = [0, 7, 0], sizes = [1, 1, 128], strides = [1, 1, 1]} : vector<1x8x128xf32> to vector<1x1x128xf32>
    %337 = vector.shape_cast %336 : vector<1x1x128xf32> to vector<1x128xf32>
    %c5_249 = arith.constant 5 : index
    %c0_250 = arith.constant 0 : index
    %c0_251 = arith.constant 0 : index
    %338 = vector.load %arg6[%c5_249, %c0_250, %c0_251] : memref<6x1x128xf32, #tpu.memory_space<vmem>>, vector<1x1x128xf32>
    %339 = vector.shape_cast %338 : vector<1x1x128xf32> to vector<1x128xf32>
    %340 = vector.shape_cast %337 : vector<1x128xf32> to vector<1x1x128xf32>
    tpu.vector_store %arg6[%c5_249, %c0_250, %c0_251], %340 {strides = array<i32>} : memref<6x1x128xf32, #tpu.memory_space<vmem>>, vector<1x1x128xf32>,
    %341 = vector.shape_cast %335 : vector<1x128xf32> to vector<1x1x128xf32>
    %342 = vector.extract_strided_slice %332 {offsets = [0, 0, 0], sizes = [1, 7, 128], strides = [1, 1, 1]} : vector<1x8x128xf32> to vector<1x7x128xf32>
    %343 = tpu.concatenate %341, %342 in 1 : vector<1x1x128xf32>, vector<1x7x128xf32> -> vector<1x8x128xf32>
    %cst_252 = arith.constant 0.000000e+00 : f32
    %344 = vector.broadcast %cst_252 : f32 to vector<1x8x128xf32>
    %c1_i32_253 = arith.constant 1 : i32
    %345 = tpu.dynamic_rotate %332 by %c1_i32_253 dim 2 : vector<1x8x128xf32>, i32 -> vector<1x8x128xf32>
    %c1_i32_254 = arith.constant 1 : i32
    %346 = tpu.dynamic_rotate %343 by %c1_i32_254 dim 2 : vector<1x8x128xf32>, i32 -> vector<1x8x128xf32>
    %347 = arith.select %6, %346, %345 : vector<1x8x128xi1>, vector<1x8x128xf32>
    %c0_255 = arith.constant 0 : index
    %c0_256 = arith.constant 0 : index
    %c0_257 = arith.constant 0 : index
    %c0_258 = arith.constant 0 : index
    %348 = vector.load %arg3[%c0_255, %c0_256, %c0_257, %c0_258] : memref<7x1x8x128xf32, #tpu.memory_space<vmem>>, vector<1x1x8x128xf32>
    %349 = vector.shape_cast %348 : vector<1x1x8x128xf32> to vector<1x8x128xf32>
    %350 = arith.mulf %347, %349 : vector<1x8x128xf32>
    %351 = arith.addf %344, %350 : vector<1x8x128xf32>
    %c2_i32_259 = arith.constant 2 : i32
    %352 = tpu.dynamic_rotate %332 by %c2_i32_259 dim 2 : vector<1x8x128xf32>, i32 -> vector<1x8x128xf32>
    %c2_i32_260 = arith.constant 2 : i32
    %353 = tpu.dynamic_rotate %343 by %c2_i32_260 dim 2 : vector<1x8x128xf32>, i32 -> vector<1x8x128xf32>
    %354 = arith.select %8, %353, %352 : vector<1x8x128xi1>, vector<1x8x128xf32>
    %c1_261 = arith.constant 1 : index
    %c0_262 = arith.constant 0 : index
    %c0_263 = arith.constant 0 : index
    %c0_264 = arith.constant 0 : index
    %355 = vector.load %arg3[%c1_261, %c0_262, %c0_263, %c0_264] : memref<7x1x8x128xf32, #tpu.memory_space<vmem>>, vector<1x1x8x128xf32>
    %356 = vector.shape_cast %355 : vector<1x1x8x128xf32> to vector<1x8x128xf32>
    %357 = arith.mulf %354, %356 : vector<1x8x128xf32>
    %358 = arith.addf %351, %357 : vector<1x8x128xf32>
    %c3_i32_265 = arith.constant 3 : i32
    %359 = tpu.dynamic_rotate %332 by %c3_i32_265 dim 2 : vector<1x8x128xf32>, i32 -> vector<1x8x128xf32>
    %c3_i32_266 = arith.constant 3 : i32
    %360 = tpu.dynamic_rotate %343 by %c3_i32_266 dim 2 : vector<1x8x128xf32>, i32 -> vector<1x8x128xf32>
    %361 = arith.select %10, %360, %359 : vector<1x8x128xi1>, vector<1x8x128xf32>
    %c2_267 = arith.constant 2 : index
    %c0_268 = arith.constant 0 : index
    %c0_269 = arith.constant 0 : index
    %c0_270 = arith.constant 0 : index
    %362 = vector.load %arg3[%c2_267, %c0_268, %c0_269, %c0_270] : memref<7x1x8x128xf32, #tpu.memory_space<vmem>>, vector<1x1x8x128xf32>
    %363 = vector.shape_cast %362 : vector<1x1x8x128xf32> to vector<1x8x128xf32>
    %364 = arith.mulf %361, %363 : vector<1x8x128xf32>
    %365 = arith.addf %358, %364 : vector<1x8x128xf32>
    %c4_i32_271 = arith.constant 4 : i32
    %366 = tpu.dynamic_rotate %332 by %c4_i32_271 dim 2 : vector<1x8x128xf32>, i32 -> vector<1x8x128xf32>
    %c4_i32_272 = arith.constant 4 : i32
    %367 = tpu.dynamic_rotate %343 by %c4_i32_272 dim 2 : vector<1x8x128xf32>, i32 -> vector<1x8x128xf32>
    %368 = arith.select %12, %367, %366 : vector<1x8x128xi1>, vector<1x8x128xf32>
    %c3_273 = arith.constant 3 : index
    %c0_274 = arith.constant 0 : index
    %c0_275 = arith.constant 0 : index
    %c0_276 = arith.constant 0 : index
    %369 = vector.load %arg3[%c3_273, %c0_274, %c0_275, %c0_276] : memref<7x1x8x128xf32, #tpu.memory_space<vmem>>, vector<1x1x8x128xf32>
    %370 = vector.shape_cast %369 : vector<1x1x8x128xf32> to vector<1x8x128xf32>
    %371 = arith.mulf %368, %370 : vector<1x8x128xf32>
    %372 = arith.addf %365, %371 : vector<1x8x128xf32>
    %c5_i32_277 = arith.constant 5 : i32
    %373 = tpu.dynamic_rotate %332 by %c5_i32_277 dim 2 : vector<1x8x128xf32>, i32 -> vector<1x8x128xf32>
    %c5_i32_278 = arith.constant 5 : i32
    %374 = tpu.dynamic_rotate %343 by %c5_i32_278 dim 2 : vector<1x8x128xf32>, i32 -> vector<1x8x128xf32>
    %375 = arith.select %14, %374, %373 : vector<1x8x128xi1>, vector<1x8x128xf32>
    %c4_279 = arith.constant 4 : index
    %c0_280 = arith.constant 0 : index
    %c0_281 = arith.constant 0 : index
    %c0_282 = arith.constant 0 : index
    %376 = vector.load %arg3[%c4_279, %c0_280, %c0_281, %c0_282] : memref<7x1x8x128xf32, #tpu.memory_space<vmem>>, vector<1x1x8x128xf32>
    %377 = vector.shape_cast %376 : vector<1x1x8x128xf32> to vector<1x8x128xf32>
    %378 = arith.mulf %375, %377 : vector<1x8x128xf32>
    %379 = arith.addf %372, %378 : vector<1x8x128xf32>
    %c6_i32_283 = arith.constant 6 : i32
    %380 = tpu.dynamic_rotate %332 by %c6_i32_283 dim 2 : vector<1x8x128xf32>, i32 -> vector<1x8x128xf32>
    %c6_i32_284 = arith.constant 6 : i32
    %381 = tpu.dynamic_rotate %343 by %c6_i32_284 dim 2 : vector<1x8x128xf32>, i32 -> vector<1x8x128xf32>
    %382 = arith.select %16, %381, %380 : vector<1x8x128xi1>, vector<1x8x128xf32>
    %c5_285 = arith.constant 5 : index
    %c0_286 = arith.constant 0 : index
    %c0_287 = arith.constant 0 : index
    %c0_288 = arith.constant 0 : index
    %383 = vector.load %arg3[%c5_285, %c0_286, %c0_287, %c0_288] : memref<7x1x8x128xf32, #tpu.memory_space<vmem>>, vector<1x1x8x128xf32>
    %384 = vector.shape_cast %383 : vector<1x1x8x128xf32> to vector<1x8x128xf32>
    %385 = arith.mulf %382, %384 : vector<1x8x128xf32>
    %386 = arith.addf %379, %385 : vector<1x8x128xf32>
    %c7_i32_289 = arith.constant 7 : i32
    %387 = tpu.dynamic_rotate %332 by %c7_i32_289 dim 2 : vector<1x8x128xf32>, i32 -> vector<1x8x128xf32>
    %c7_i32_290 = arith.constant 7 : i32
    %388 = tpu.dynamic_rotate %343 by %c7_i32_290 dim 2 : vector<1x8x128xf32>, i32 -> vector<1x8x128xf32>
    %389 = arith.select %18, %388, %387 : vector<1x8x128xi1>, vector<1x8x128xf32>
    %c6_291 = arith.constant 6 : index
    %c0_292 = arith.constant 0 : index
    %c0_293 = arith.constant 0 : index
    %c0_294 = arith.constant 0 : index
    %390 = vector.load %arg3[%c6_291, %c0_292, %c0_293, %c0_294] : memref<7x1x8x128xf32, #tpu.memory_space<vmem>>, vector<1x1x8x128xf32>
    %391 = vector.shape_cast %390 : vector<1x1x8x128xf32> to vector<1x8x128xf32>
    %392 = arith.mulf %389, %391 : vector<1x8x128xf32>
    %393 = arith.addf %386, %392 : vector<1x8x128xf32>
    %cst_295 = arith.constant 0.166666672 : f32
    %394 = vector.broadcast %cst_295 : f32 to vector<1x8x128xf32>
    %395 = arith.mulf %393, %394 : vector<1x8x128xf32>
    %396 = arith.addf %333, %395 : vector<1x8x128xf32>
    %c0_296 = arith.constant 0 : index
    %c0_297 = arith.constant 0 : index
    %c0_298 = arith.constant 0 : index
    %397 = vector.load %arg4[%c0_296, %c0_297, %c0_298] : memref<1x8x128xf32, #tpu.memory_space<vmem>>, vector<1x8x128xf32>
    %398 = math.exp %397 : vector<1x8x128xf32>
    %399 = arith.mulf %396, %398 : vector<1x8x128xf32>
    %c0_299 = arith.constant 0 : index
    %c0_300 = arith.constant 0 : index
    %c0_301 = arith.constant 0 : index
    %400 = vector.load %arg5[%c0_299, %c0_300, %c0_301] : memref<1x8x128xf32, #tpu.memory_space<vmem>>, vector<1x8x128xf32>
    tpu.vector_store %arg5[%c0_299, %c0_300, %c0_301], %399 {strides = array<i32>} : memref<1x8x128xf32, #tpu.memory_space<vmem>>, vector<1x8x128xf32>,
    return
  }
  func.func @transform_0(%arg0: i32, %arg1: i32) -> (i32, i32, i32) {
    %c0_i32 = arith.constant 0 : i32
    %c0_i32_0 = arith.constant 0 : i32
    return %arg0, %arg1, %c0_i32 : i32, i32, i32
  }
  func.func @transform_1(%arg0: i32, %arg1: i32) -> (i32, i32, i32, i32) {
    %c0_i32 = arith.constant 0 : i32
    %c0_i32_0 = arith.constant 0 : i32
    %c0_i32_1 = arith.constant 0 : i32
    return %c0_i32, %arg0, %arg1, %c0_i32_0 : i32, i32, i32, i32
  }
  func.func @transform_2(%arg0: i32, %arg1: i32) -> (i32, i32, i32) {
    %c0_i32 = arith.constant 0 : i32
    %c0_i32_0 = arith.constant 0 : i32
    return %arg0, %arg1, %c0_i32 : i32, i32, i32
  }
  func.func @transform_3(%arg0: i32, %arg1: i32) -> (i32, i32, i32) {
    %c0_i32 = arith.constant 0 : i32
    %c0_i32_0 = arith.constant 0 : i32
    return %arg0, %arg1, %c0_i32 : i32, i32, i32
  }
}

</mosaic_0001>

<bundles_post_ra>
// kernel: tpu_custom_call.1
= control target key start
LH: loop header
LB: loop body
LE: loop exit
PB: predicated region body
PF: predicated region fallthrough
CT: control target
= control target key end

     0   :  { %s1699_s0 = inlined_call_operand.hbm [shape: f32[2,16,128], index: 0, kind: input, shape index: {}]   ;;  %s1700_s1 = inlined_call_operand.hbm [shape: f32[7,2,16,128], index: 1, kind: input, shape index: {}]   ;;  %s1701_s2 = inlined_call_operand.hbm [shape: f32[2,16,128], index: 2, kind: input, shape index: {}]   ;;  %s1702_s3 = inlined_call_operand.hbm [shape: f32[2,16,128], index: 3, kind: output, shape index: {}]  }
   0x1   :  { %1708 = sst [smem:[#allocation19_spill]] %s1700_s1 }
   0x2   :  { %8 = vsyncpa [#allocation4], 0 }
   0x3   :  { %10 = vsyncpa [#allocation4 + $0x1], 0 }
   0x4   :  { %11 = vsyncpa [#allocation7], 0 }
   0x5   :  { %13 = vsyncpa [#allocation7 + $0x1], 0 }
   0x6   :  { %14 = vsyncpa [#allocation5], 0 }
   0x7   :  { %16 = vsyncpa [#allocation5 + $0x1], 0  ;;  %s1247_s12 = smov 0   ;;  %s1249_s13 = smov 0  }
   0x8   :  { %s1251_s14 = smov 0   ;;  %s1253_s15 = smov 0  }
   0x9   :  { %s1255_s16 = smov 0   ;;  %s1257_s17 = smov 0  }
   0xa   :  { %s1259_s18 = smov 0   ;;  %s1261_s19 = smov 0  }
   0xb LB: > { %1709 = sst [smem:[#allocation13_spill]] %s1194_s14  ;;  %s1288_s20 = sadd.s32 4294967295, %s1214_s19   ;;  %s1214_s19 = sphi %s1261_s19, %s22_s19   ;;  %s1210_s18 = sphi %s1259_s18, %s1727_s18   ;;  %s1206_s17 = sphi %s1257_s17, %s1726_s17   ;;  %s1202_s16 = sphi %s1255_s16, %s1725_s16   ;;  %s1198_s15 = sphi %s1253_s15, %s1724_s15   ;;  %s1194_s14 = sphi %s1251_s14, %s1723_s14   ;;  %s1190_s13 = sphi %s1249_s13, %s1729_s13   ;;  %s1186_s12 = sphi %s1247_s12, %s1728_s12  }
   0xc   : > { %1710 = sst [smem:[#allocation14_spill]] %s1206_s17  ;;  %s862_s21 = sadd.s32 4294967294, %s1214_s19  }
   0xd   : > { %1711 = sst [smem:[#allocation15_spill]] %s1210_s18  ;;  %s31_s22 = sadd.s32 1, %s1206_s17 }
   0xe   : > { %s34_s23 = sadd.s32 1, %s1210_s18  ;;  %p32_p0 = scmp.ge.s32.totalorder %s31_s22, 2 }
   0xf   : > { %s43_s24 = sadd.s32 1, %s1194_s14  ;;  %p50_p1 = scmp.ne.s32.totalorder %s1194_s14, %s1190_s13 }
  0x10   : > { %p51_p2 = scmp.eq.s32.totalorder %s1214_s19, 0  ;;  %s1731_s22 = smov (%p32_p0, %s31_s22), 0 }
  0x11   : > { %1712 = sst [smem:[#allocation16_spill]] %s1731_s22  ;;  %s1733_s23 = smov (!%p32_p0, %s34_s23), %s1210_s18 }
  0x12   : > { %s39_s25 = ssub.s32 %s1206_s17, %s1731_s22  ;;  %p1302_p3 = por %p51_p2, %p50_p1 }
  0x13   : > { %p36_p4 = scmp.ge.s32.totalorder %s1733_s23, 2  ;;  %p56_p5 = scmp.ne.s32.totalorder %s1190_s13, %s1186_s12 }
  0x14   : > { %p57_p6 = scmp.eq.s32.totalorder %s1288_s20, 0  ;;  %p138_p7 = scmp.eq.s32.totalorder %s1288_s20, 3 }
  0x15   : > { %s1735_s23 = smov (%p36_p4, %s1733_s23), 0  ;;  %p144_p10 = scmp.eq.s32.totalorder %s862_s21, 3 }
  0x16   : > { %1714 = sst [smem:[#allocation17_spill]] %s1735_s23  ;;  %p1312_p8 = por %p57_p6, %p56_p5 }
  0x17   : > { %p1316_p9 = por %p138_p7, %p50_p1  ;;  %s38_s29 = ssub.s32 %s1210_s18, %s1735_s23 }
  0x18   : > { %s40_s30 = sor.u32 %s39_s25, %s38_s29  ;;  %p1322_p12 = por %p144_p10, %p56_p5 }
  0x19   : > { %p41_p11 = scmp.eq.s32.totalorder %s40_s30, 0  ;;  %p943_p13 = scmp.lt.s32.totalorder %s1214_s19, 4 }
  0x1a   : > { %s1328_s5 = sand.u32 1, %s1194_s14   ;;  %s866_s7 = sshll.u32 %s1210_s18, 1 }
  0x1b   : > { %s1331_s6 = scalar_select %p41_p11, %s1194_s14, %s43_s24  }
  0x1c   : > { %p1336_p0 = pnand %p943_p13, %p1302_p3  ;;  %s172_s9 = sadd.s32 %s1206_s17, %s866_s7 }
  0x1d   : > { %1718 = sst [smem:[#allocation18_spill]] %s1331_s6  ;;  %s185_s10 = sand.u32 1, %s1214_s19  }
  0x1e   : > { %s867_s11 = sshll.u32 %s172_s9, 3  ;;  %s919_s21 = smul.u32 56, %s1328_s5 }
  0x1f   : > { %s1720_s1 = sld [smem:[#allocation19_spill]]  ;;  %p873_p1 = scmp.ge.s32.totalorder %s1214_s19, 1 }
  0x20   : > { %s189_s24 = scalar_lea.vmem [#allocation6], %s919_s21  ;;  %s186_s26 = scalar_lea.sflag [#allocation7], %s185_s10 }
  0x21   : > { %s198_s22 = sshll.u32 %s189_s24, 4  ;;  %s1216_s18 = smov 512   ;;  %s199_s22 = int_to_ptr.vmem [resolvable:$true] %s198_s22 }
  0x22   : > { %s1217_s7 = smov 128   ;;  %s1218_s17 = smov 8  }
  0x23   : > { %p227_p2 = scmp.lt.s32.totalorder %s1214_s19, 5  ;;  %s865_s25 = sshll.u32 %s1328_s5, 3 }
  0x24   : > { %s165_s10 = scalar_lea.sflag [#allocation4], %s1328_s5 }
  0x25   : > { %s195_s30 = scalar_lea.hbm %s1720_s1, %s867_s11  ;;  %p1350_p3 = pnand %p873_p1, %p227_p2 }
  0x26   : > { %s196_s23 = sshll.u32 %s195_s30, 4  ;;  %s174_s30 = scalar_lea.hbm %s1699_s0, %s867_s11  ;;  %s197_s23 = int_to_ptr.hbm [resolvable:$true] %s196_s23 }
  0x27   : > { %935 = dma.hbm_to_vmem [thread:$0]  (!%p1336_p0), %s197_s23, 896, %s199_s22, %s186_s26, %s1216_s18, %s1217_s7, %s1218_s17  }
  0x28   : > { %s176_s24 = sshll.u32 %s174_s30, 4  ;;  %s168_s1 = scalar_lea.vmem [#allocation3], %s865_s25  ;;  %s177_s24 = int_to_ptr.hbm [resolvable:$true] %s176_s24 }
  0x29   : > { %s178_s6 = sshll.u32 %s168_s1, 4  ;;  %s218_s22 = scalar_lea.hbm %s1701_s2, %s867_s11  ;;  %s179_s6 = int_to_ptr.vmem [resolvable:$true] %s178_s6 }
  0x2a   : > { %932 = dma.hbm_to_vmem [thread:$0]  (!%p1336_p0), %s177_s24, 128, %s179_s6, %s165_s10  }
  0x2b   : > { %s220_s23 = sshll.u32 %s218_s22, 4  ;;  %s212_s7 = scalar_lea.vmem [#allocation8], %s865_s25  ;;  %s221_s23 = int_to_ptr.hbm [resolvable:$true] %s220_s23 }
  0x2c   : > { %s222_s14 = sshll.u32 %s212_s7, 4  ;;  %231 = sbr.rel (%p1350_p3) target bundleno = 1002 (0x3ea), region = 32  ;;  %s223_s14 = int_to_ptr.vmem [resolvable:$true] %s222_s14 }
  0x2d   : > { %938 = dma.hbm_to_vmem [thread:$0]  (!%p1336_p0), %s221_s23, 128, %s223_s14, %s186_s26  }
  0x2e   : > { %s1369_s1 = sand.u32 (!%p1350_p3), 1, %s1190_s13  }
  0x2f   : > { %s1372_s5 = sshll.u32 (!%p1350_p3), %s1369_s1, 3  ;;  %s234_s6 = scalar_lea.sflag (!%p1350_p3), [#allocation4], %s1369_s1 }
  0x30   : > { %s237_s11 = scalar_lea.vmem (!%p1350_p3), [#allocation3], %s1372_s5 }
  0x31   : > { %1173 = dma.done.wait (%p1312_p8), %s234_s6, 128  }
  0x32   : > { %1175 = vsyncadd (%p1312_p8), %s234_s6, 4294967168  ;;  %s243_s14 = sand.u32 1, %s1288_s20   ;;  %s920_s8 = smul.u32 56, %s1369_s1 }
  0x33   : > { %s244_s26 = scalar_lea.sflag [#allocation7], %s243_s14 }
  0x34   : > { %s1382_s9 = scalar_lea.vmem [#allocation6], %s920_s8 }
  0x35   : > { %1177 = dma.done.wait (%p1312_p8), %s244_s26, 1024  }
  0x36   : > { %1179 = vsyncadd (%p1312_p8), %s244_s26, 4294966272  ;;  %s257_s25 = scalar_lea.vmem [#allocation8], %s1372_s5  ;;  %s290_s29 = scalar_lea.vmem [#allocation9], %s1372_s5 }
  0x37   : > { %p877_p4 = scmp.ne.s32.totalorder %s1198_s15, 0 }
  0x39   : > { %294 = sbr.rel (%p877_p4) target bundleno = 69 (0x45), region = 48 }
  0x3e   : > { %v1219_v0 = vmov 0.0  }
  0x3f   : > { %295 = vst [vmem:[#allocation2] sm:$0x1] %v1219_v0 }
  0x40   : > { %296 = vst [vmem:[#allocation2 + $0x1] sm:$0x1] %v1219_v0 }
  0x41   : > { %297 = vst [vmem:[#allocation2 + $0x2] sm:$0x1] %v1219_v0 }
  0x42   : > { %298 = vst [vmem:[#allocation2 + $0x3] sm:$0x1] %v1219_v0 }
  0x43   : > { %299 = vst [vmem:[#allocation2 + $0x4] sm:$0x1] %v1219_v0 }
  0x44   : > { %300 = vst [vmem:[#allocation2 + $0x5] sm:$0x1] %v1219_v0 }
  0x45 PF: > { %v1391_v1 = vld [vmem:[%s237_s11] sm:$0xff]  ;;  %s1220_s20 = smov 2   ;;  %s1221_s27 = smov 1   ;;  %vm316_vm0 = vcmask 1040384   ;;  %v302_v8 = vlaneseq  ;;  %v1422_v13 = vld [vmem:[%s1382_s9 + $0x8] sm:$0xff]  ;;  %v1441_v24 = vld [vmem:[%s1382_s9 + $0x18] sm:$0xff] }
  0x46   : > { %v311_v2 = vld [vmem:[#allocation2] sm:$0x1]  ;;  %326 = vrot.lane.b32.xlu1 %v1391_v1, %s1220_s20  ;;  %318 = vrot.lane.b32.xlu0 %v1391_v1, %s1221_s27  ;;  %v314_v3 = vrot.slane %v1391_v1, 7  ;;  %s1222_s21 = smov 3   ;;  %s1223_s30 = smov 4   ;;  %v1427_v15 = vld [vmem:[%s1382_s9] sm:$0xff] }
  0x47   : > { %312 = vst [vmem:[#allocation2 - $0x7] sm:$0x80] %v1391_v1  ;;  %335 = vrot.lane.b32.xlu2 %v1391_v1, %s1222_s21  ;;  %s1224_s24 = smov 5   ;;  %s1225_s10 = smov 6   ;;  %v1417_v12 = vand.u32 127, %v302_v8  ;;  %v1436_v22 = vld [vmem:[%s1382_s9 + $0x10] sm:$0xff] }
  0x48   : > { %v317_v4 = vsel %vm316_vm0, %v311_v2, %v314_v3  ;;  %s1226_s17 = smov 7   ;;  %v1447_v27 = vld [vmem:[%s1382_s9 + $0x20] sm:$0xff]  ;;  %v1456_v37 = vld [vmem:[%s1382_s9 + $0x28] sm:$0xff]  ;;  %v1462_v40 = vld [vmem:[%s1382_s9 + $0x30] sm:$0xff]  ;;  %s915_s18 = sshll.u32 %s1202_s16, 1 }
  0x49   : > { %vm305_vm1 = vcmp.lt.s32.totalorder %v1417_v12, 2  ;;  %vm304_vm2 = vcmp.lt.s32.totalorder %v1417_v12, 1  ;;  %vm306_vm3 = vcmp.lt.s32.totalorder %v1417_v12, 3  ;;  %vm307_vm4 = vcmp.lt.s32.totalorder %v1417_v12, 4  ;;  %v382_v47 = vld [vmem:[#allocation2 + $0x1] sm:$0x1]  ;;  %s722_s22 = sadd.s32 %s1198_s15, %s915_s18 }
  0x4a   : > { %vm308_vm5 = vcmp.lt.s32.totalorder %v1417_v12, 5  ;;  %vm309_vm6 = vcmp.lt.s32.totalorder %v1417_v12, 6  ;;  %vm310_vm7 = vcmp.lt.s32.totalorder %v1417_v12, 7  ;;  %s916_s23 = sshll.u32 %s722_s22, 3  ;;  %s726_s6 = sshll.u32 %s290_s29, 4  ;;  %s727_s6 = int_to_ptr.vmem [resolvable:$true] %s726_s6 }
  0x4b   : > { %s724_s15 = scalar_lea.hbm %s1702_s3, %s916_s23  ;;  %s712_s14 = scalar_lea.sflag [#allocation5], %s1369_s1 }
  0x4c   : > { %s728_s11 = sshll.u32 %s724_s15, 4  ;;  %s729_s11 = int_to_ptr.hbm [resolvable:$true] %s728_s11 }
  0x4d   : > { %s1126_s8 = sshra.s32 %s729_s11, 4  ;;  %s1127_s8 = int_to_ptr.hbm [resolvable:$true] %s1126_s8 }
  0x4e   : > { %328 = vrot.lane.b32.xlu1 %v317_v4, %s1220_s20  ;;  %320 = vrot.lane.b32.xlu0 %v317_v4, %s1221_s27  ;;  %s1128_s26 = scalar_lea.hbm %s1127_s8, 8  ;;  %p1133_p8 = scmp.lt.s32.totalorder %s1127_s8, %s1702_s3 }
  0x4f   : > { %337 = vrot.lane.b32.xlu2 %v317_v4, %s1222_s21  ;;  %p1129_p5 = scmp.ne.s32.totalorder %s1127_s8, %s1128_s26 }
  0x51   : > { %p1130_p6 = pnand %p1129_p5, %p1316_p9 }
  0x53   : > { %p1131_p7 = pneg %p1130_p6 }
  0x56   : > { %346 = vrot.lane.b32.xlu1 %v317_v4, %s1223_s30  ;;  %344 = vrot.lane.b32.xlu0 %v1391_v1, %s1223_s30 }
  0x57   : > { %353 = vrot.lane.b32.xlu2 %v1391_v1, %s1224_s24 }
  0x5e   : > { %362 = vrot.lane.b32.xlu1 %v1391_v1, %s1225_s10  ;;  %355 = vrot.lane.b32.xlu0 %v317_v4, %s1224_s24 }
  0x5f   : > { %364 = vrot.lane.b32.xlu2 %v317_v4, %s1225_s10 }
  0x66   : > { %373 = vrot.lane.b32.xlu1 %v317_v4, %s1226_s17  ;;  %371 = vrot.lane.b32.xlu0 %v1391_v1, %s1226_s17 }
  0xa1   : > { %v336_v5 = vpop.permute.xlu2 %335 }
  0xa9   : > { %v338_v9 = vpop.permute.xlu2 %337 }
  0xaa   : > { %v339_v23 = vsel %vm306_vm3, %v338_v9, %v336_v5 }
  0xab   : > { %v342_v28 = vmul.f32 %v1436_v22, %v339_v23 }
  0xb1   : > { %v354_v17 = vpop.permute.xlu2 %353 }
  0xb8   : > { %v327_v6 = vpop.permute.xlu1 %326  ;;  %v319_v7 = vpop.permute.xlu0 %318 }
  0xb9   : > { %v365_v34 = vpop.permute.xlu2 %364 }
  0xc0   : > { %v329_v10 = vpop.permute.xlu1 %328  ;;  %v321_v11 = vpop.permute.xlu0 %320 }
  0xc1   : > { %v330_v14 = vsel %vm305_vm1, %v329_v10, %v327_v6  ;;  %v322_v16 = vsel %vm304_vm2, %v321_v11, %v319_v7 }
  0xc2   : > { %v333_v20 = vmul.f32 %v1422_v13, %v330_v14  ;;  %v324_v21 = vmul.f32 %v1427_v15, %v322_v16 }
  0xc4   : > { %v334_v26 = vadd.f32 %v333_v20, %v324_v21 }
  0xc6   : > { %v343_v33 = vadd.f32 %v342_v28, %v334_v26  ;;  %v447_v28 = vld [vmem:[#allocation2 + $0x2] sm:$0x1] }
  0xc8   : > { %v347_v18 = vpop.permute.xlu1 %346  ;;  %v345_v19 = vpop.permute.xlu0 %344 }
  0xc9   : > { %v348_v25 = vsel %vm307_vm4, %v347_v18, %v345_v19 }
  0xca   : > { %v351_v29 = vmul.f32 %v1441_v24, %v348_v25 }
  0xcc   : > { %v352_v36 = vadd.f32 %v351_v29, %v343_v33 }
  0xd0   : > { %v363_v30 = vpop.permute.xlu1 %362  ;;  %v356_v31 = vpop.permute.xlu0 %355 }
  0xd1   : > { %v357_v32 = vsel %vm308_vm5, %v356_v31, %v354_v17  ;;  %v366_v38 = vsel %vm309_vm6, %v365_v34, %v363_v30 }
  0xd2   : > { %v360_v35 = vmul.f32 %v1447_v27, %v357_v32  ;;  %v369_v41 = vmul.f32 %v1456_v37, %v366_v38 }
  0xd4   : > { %v361_v39 = vadd.f32 %v360_v35, %v352_v36 }
  0xd6   : > { %v370_v45 = vadd.f32 %v369_v41, %v361_v39 }
  0xd8   : > { %v374_v42 = vpop.permute.xlu1 %373  ;;  %v372_v43 = vpop.permute.xlu0 %371 }
  0xd9   : > { %v375_v44 = vsel %vm310_vm7, %v374_v42, %v372_v43 }
  0xda   : > { %v378_v46 = vmul.f32 %v1462_v40, %v375_v44 }
  0xdc   : > { %v379_v48 = vadd.f32 %v378_v46, %v370_v45 }
  0xde   : > { %404 = vrot.lane.b32.xlu0 %v379_v48, %s1222_s21  ;;  %396 = vrot.lane.b32.xlu1 %v379_v48, %s1220_s20  ;;  %383 = vst [vmem:[#allocation2 - $0x6] sm:$0x80] %v379_v48  ;;  %v385_v49 = vrot.slane %v379_v48, 7  ;;  %v380_v30 = vadd.f32 %v379_v48, %v1391_v1 }
  0xdf   : > { %388 = vrot.lane.b32.xlu2 %v379_v48, %s1221_s27 }
  0xe0   : > { %v387_v50 = vsel %vm316_vm0, %v382_v47, %v385_v49 }
  0xe6   : > { %428 = vrot.lane.b32.xlu0 %v379_v48, %s1225_s10  ;;  %420 = vrot.lane.b32.xlu1 %v379_v48, %s1224_s24 }
  0xe7   : > { %412 = vrot.lane.b32.xlu2 %v379_v48, %s1223_s30 }
  0xee   : > { %406 = vrot.lane.b32.xlu1 %v387_v50, %s1222_s21  ;;  %390 = vrot.lane.b32.xlu0 %v387_v50, %s1221_s27 }
  0xef   : > { %398 = vrot.lane.b32.xlu2 %v387_v50, %s1220_s20 }
  0xf6   : > { %430 = vrot.lane.b32.xlu1 %v387_v50, %s1225_s10  ;;  %414 = vrot.lane.b32.xlu0 %v387_v50, %s1223_s30 }
  0xf7   : > { %422 = vrot.lane.b32.xlu2 %v387_v50, %s1224_s24 }
  0xfe   : > { %438 = vrot.lane.b32.xlu0 %v387_v50, %s1226_s17 }
  0xff   : > { %436 = vrot.lane.b32.xlu2 %v379_v48, %s1226_s17 }
 0x139   : > { %v389_v51 = vpop.permute.xlu2 %388 }
 0x141   : > { %v413_v54 = vpop.permute.xlu2 %412 }
 0x149   : > { %v399_v57 = vpop.permute.xlu2 %398 }
 0x150   : > { %v405_v52 = vpop.permute.xlu0 %404  ;;  %v397_v53 = vpop.permute.xlu1 %396 }
 0x151   : > { %v400_v60 = vsel %vm305_vm1, %v399_v57, %v397_v53  ;;  %v423_v2 = vpop.permute.xlu2 %422 }
 0x152   : > { %v402_v63 = vmul.f32 %v1422_v13, %v400_v60 }
 0x158   : > { %v429_v55 = vpop.permute.xlu0 %428  ;;  %v421_v56 = vpop.permute.xlu1 %420 }
 0x159   : > { %v424_v6 = vsel %vm308_vm5, %v423_v2, %v421_v56  ;;  %v437_v18 = vpop.permute.xlu2 %436 }
 0x15a   : > { %v426_v11 = vmul.f32 %v1447_v27, %v424_v6  ;;  %v512_v6 = vld [vmem:[#allocation2 + $0x3] sm:$0x1] }
 0x160   : > { %v407_v58 = vpop.permute.xlu1 %406  ;;  %v391_v59 = vpop.permute.xlu0 %390 }
 0x161   : > { %v392_v61 = vsel %vm304_vm2, %v391_v59, %v389_v51  ;;  %v408_v0 = vsel %vm306_vm3, %v407_v58, %v405_v52 }
 0x162   : > { %v394_v62 = vmul.f32 %v392_v61, %v1427_v15  ;;  %v410_v4 = vmul.f32 %v1436_v22, %v408_v0 }
 0x164   : > { %v403_v3 = vadd.f32 %v402_v63, %v394_v62 }
 0x166   : > { %v411_v9 = vadd.f32 %v410_v4, %v403_v3 }
 0x168   : > { %v415_v5 = vpop.permute.xlu0 %414  ;;  %v431_v8 = vpop.permute.xlu1 %430 }
 0x169   : > { %v416_v7 = vsel %vm307_vm4, %v415_v5, %v413_v54  ;;  %v432_v16 = vsel %vm309_vm6, %v431_v8, %v429_v55 }
 0x16a   : > { %v418_v10 = vmul.f32 %v1441_v24, %v416_v7  ;;  %v434_v19 = vmul.f32 %v1456_v37, %v432_v16 }
 0x16c   : > { %v419_v14 = vadd.f32 %v418_v10, %v411_v9 }
 0x16e   : > { %v427_v17 = vadd.f32 %v426_v11, %v419_v14 }
 0x170   : > { %v439_v20 = vpop.permute.xlu0 %438  ;;  %v435_v23 = vadd.f32 %v434_v19, %v427_v17 }
 0x171   : > { %v440_v21 = vsel %vm310_vm7, %v439_v20, %v437_v18 }
 0x172   : > { %v442_v25 = vmul.f32 %v1462_v40, %v440_v21 }
 0x174   : > { %v443_v26 = vadd.f32 %v442_v25, %v435_v23 }
 0x176   : > { %v444_v29 = vmul.f32 0.5, %v443_v26 }
 0x178   : > { %469 = vrot.lane.b32.xlu2 %v444_v29, %s1222_s21  ;;  %461 = vrot.lane.b32.xlu0 %v444_v29, %s1220_s20  ;;  %448 = vst [vmem:[#allocation2 - $0x5] sm:$0x80] %v444_v29  ;;  %v445_v31 = vadd.f32 %v444_v29, %v380_v30  ;;  %v450_v32 = vrot.slane %v444_v29, 7 }
 0x179   : > { %453 = vrot.lane.b32.xlu1 %v444_v29, %s1221_s27 }
 0x17a   : > { %v452_v33 = vsel %vm316_vm0, %v447_v28, %v450_v32 }
 0x180   : > { %493 = vrot.lane.b32.xlu2 %v444_v29, %s1225_s10  ;;  %485 = vrot.lane.b32.xlu0 %v444_v29, %s1224_s24 }
 0x181   : > { %477 = vrot.lane.b32.xlu1 %v444_v29, %s1223_s30 }
 0x188   : > { %471 = vrot.lane.b32.xlu0 %v452_v33, %s1222_s21  ;;  %455 = vrot.lane.b32.xlu2 %v452_v33, %s1221_s27 }
 0x189   : > { %463 = vrot.lane.b32.xlu1 %v452_v33, %s1220_s20 }
 0x190   : > { %495 = vrot.lane.b32.xlu0 %v452_v33, %s1225_s10  ;;  %479 = vrot.lane.b32.xlu2 %v452_v33, %s1223_s30 }
 0x191   : > { %487 = vrot.lane.b32.xlu1 %v452_v33, %s1224_s24 }
 0x198   : > { %503 = vrot.lane.b32.xlu2 %v452_v33, %s1226_s17 }
 0x199   : > { %501 = vrot.lane.b32.xlu1 %v444_v29, %s1226_s17 }
 0x1d2   : > { %v470_v1 = vpop.permute.xlu2 %469 }
 0x1da   : > { %v494_v36 = vpop.permute.xlu2 %493 }
 0x1e2   : > { %v456_v41 = vpop.permute.xlu2 %455 }
 0x1ea   : > { %v462_v34 = vpop.permute.xlu0 %461  ;;  %v480_v50 = vpop.permute.xlu2 %479 }
 0x1eb   : > { %v454_v35 = vpop.permute.xlu1 %453 }
 0x1ec   : > { %v457_v42 = vsel %vm304_vm2, %v456_v41, %v454_v35 }
 0x1ed   : > { %v459_v46 = vmul.f32 %v457_v42, %v1427_v15 }
 0x1f2   : > { %v486_v38 = vpop.permute.xlu0 %485  ;;  %v504_v62 = vpop.permute.xlu2 %503 }
 0x1f3   : > { %v478_v39 = vpop.permute.xlu1 %477 }
 0x1f4   : > { %v481_v52 = vsel %vm307_vm4, %v480_v50, %v478_v39 }
 0x1f5   : > { %v483_v56 = vmul.f32 %v1441_v24, %v481_v52  ;;  %v577_v52 = vld [vmem:[#allocation2 + $0x4] sm:$0x1] }
 0x1fa   : > { %v472_v43 = vpop.permute.xlu0 %471 }
 0x1fb   : > { %v464_v44 = vpop.permute.xlu1 %463  ;;  %v473_v48 = vsel %vm306_vm3, %v472_v43, %v470_v1 }
 0x1fc   : > { %v465_v45 = vsel %vm305_vm1, %v464_v44, %v462_v34  ;;  %v475_v51 = vmul.f32 %v1436_v22, %v473_v48 }
 0x1fd   : > { %v467_v47 = vmul.f32 %v1422_v13, %v465_v45 }
 0x1ff   : > { %v468_v49 = vadd.f32 %v467_v47, %v459_v46 }
 0x201   : > { %v476_v53 = vadd.f32 %v475_v51, %v468_v49 }
 0x202   : > { %v496_v57 = vpop.permute.xlu0 %495 }
 0x203   : > { %v488_v54 = vpop.permute.xlu1 %487  ;;  %v484_v59 = vadd.f32 %v483_v56, %v476_v53  ;;  %v497_v60 = vsel %vm309_vm6, %v496_v57, %v494_v36 }
 0x204   : > { %v489_v55 = vsel %vm308_vm5, %v488_v54, %v486_v38  ;;  %v499_v63 = vmul.f32 %v1456_v37, %v497_v60 }
 0x205   : > { %v491_v58 = vmul.f32 %v1447_v27, %v489_v55 }
 0x207   : > { %v492_v61 = vadd.f32 %v491_v58, %v484_v59 }
 0x209   : > { %v500_v3 = vadd.f32 %v499_v63, %v492_v61 }
 0x20b   : > { %v502_v0 = vpop.permute.xlu1 %501 }
 0x20c   : > { %v505_v2 = vsel %vm310_vm7, %v504_v62, %v502_v0 }
 0x20d   : > { %v507_v4 = vmul.f32 %v1462_v40, %v505_v2 }
 0x20f   : > { %v508_v5 = vadd.f32 %v507_v4, %v500_v3 }
 0x211   : > { %v509_v7 = vmul.f32 0.33333334, %v508_v5 }
 0x213   : > { %534 = vrot.lane.b32.xlu1 %v509_v7, %s1222_s21  ;;  %526 = vrot.lane.b32.xlu2 %v509_v7, %s1220_s20  ;;  %513 = vst [vmem:[#allocation2 - $0x4] sm:$0x80] %v509_v7  ;;  %v510_v8 = vadd.f32 %v509_v7, %v445_v31  ;;  %v515_v9 = vrot.slane %v509_v7, 7 }
 0x214   : > { %518 = vrot.lane.b32.xlu0 %v509_v7, %s1221_s27 }
 0x215   : > { %v517_v10 = vsel %vm316_vm0, %v512_v6, %v515_v9 }
 0x21b   : > { %558 = vrot.lane.b32.xlu1 %v509_v7, %s1225_s10  ;;  %550 = vrot.lane.b32.xlu2 %v509_v7, %s1224_s24 }
 0x21c   : > { %542 = vrot.lane.b32.xlu0 %v509_v7, %s1223_s30 }
 0x223   : > { %536 = vrot.lane.b32.xlu2 %v517_v10, %s1222_s21  ;;  %520 = vrot.lane.b32.xlu1 %v517_v10, %s1221_s27 }
 0x224   : > { %528 = vrot.lane.b32.xlu0 %v517_v10, %s1220_s20 }
 0x22b   : > { %560 = vrot.lane.b32.xlu2 %v517_v10, %s1225_s10  ;;  %544 = vrot.lane.b32.xlu1 %v517_v10, %s1223_s30 }
 0x22c   : > { %552 = vrot.lane.b32.xlu0 %v517_v10, %s1224_s24 }
 0x233   : > { %568 = vrot.lane.b32.xlu1 %v517_v10, %s1226_s17 }
 0x234   : > { %566 = vrot.lane.b32.xlu0 %v509_v7, %s1226_s17 }
 0x26d   : > { %v527_v11 = vpop.permute.xlu2 %526 }
 0x275   : > { %v551_v18 = vpop.permute.xlu2 %550 }
 0x27d   : > { %v537_v28 = vpop.permute.xlu2 %536 }
 0x285   : > { %v535_v14 = vpop.permute.xlu1 %534  ;;  %v561_v41 = vpop.permute.xlu2 %560 }
 0x286   : > { %v519_v16 = vpop.permute.xlu0 %518  ;;  %v538_v30 = vsel %vm306_vm3, %v537_v28, %v535_v14 }
 0x287   : > { %v540_v32 = vmul.f32 %v1436_v22, %v538_v30 }
 0x28d   : > { %v559_v17 = vpop.permute.xlu1 %558 }
 0x28e   : > { %v543_v19 = vpop.permute.xlu0 %542  ;;  %v562_v43 = vsel %vm309_vm6, %v561_v41, %v559_v17 }
 0x28f   : > { %v564_v46 = vmul.f32 %v1456_v37, %v562_v43 }
 0x295   : > { %v521_v20 = vpop.permute.xlu1 %520 }
 0x296   : > { %v529_v21 = vpop.permute.xlu0 %528  ;;  %v522_v23 = vsel %vm304_vm2, %v521_v20, %v519_v16 }
 0x297   : > { %v530_v25 = vsel %vm305_vm1, %v529_v21, %v527_v11  ;;  %v524_v26 = vmul.f32 %v522_v23, %v1427_v15 }
 0x298   : > { %v532_v29 = vmul.f32 %v1422_v13, %v530_v25 }
 0x29a   : > { %v533_v31 = vadd.f32 %v532_v29, %v524_v26 }
 0x29c   : > { %v541_v36 = vadd.f32 %v540_v32, %v533_v31 }
 0x29d   : > { %v545_v33 = vpop.permute.xlu1 %544 }
 0x29e   : > { %v553_v1 = vpop.permute.xlu0 %552  ;;  %v546_v34 = vsel %vm307_vm4, %v545_v33, %v543_v19 }
 0x29f   : > { %v554_v35 = vsel %vm308_vm5, %v553_v1, %v551_v18  ;;  %v548_v38 = vmul.f32 %v1441_v24, %v546_v34  ;;  %v642_v1 = vld [vmem:[#allocation2 + $0x5] sm:$0x1] }
 0x2a0   : > { %v556_v42 = vmul.f32 %v1447_v27, %v554_v35 }
 0x2a1   : > { %v549_v39 = vadd.f32 %v548_v38, %v541_v36 }
 0x2a3   : > { %v557_v44 = vadd.f32 %v556_v42, %v549_v39 }
 0x2a5   : > { %v569_v45 = vpop.permute.xlu1 %568  ;;  %v565_v49 = vadd.f32 %v564_v46, %v557_v44 }
 0x2a6   : > { %v567_v47 = vpop.permute.xlu0 %566 }
 0x2a7   : > { %v570_v48 = vsel %vm310_vm7, %v569_v45, %v567_v47 }
 0x2a8   : > { %v572_v50 = vmul.f32 %v1462_v40, %v570_v48 }
 0x2aa   : > { %v573_v51 = vadd.f32 %v572_v50, %v565_v49 }
 0x2ac   : > { %v574_v53 = vmul.f32 0.25, %v573_v51 }
 0x2ae   : > { %599 = vrot.lane.b32.xlu0 %v574_v53, %s1222_s21  ;;  %591 = vrot.lane.b32.xlu1 %v574_v53, %s1220_s20  ;;  %578 = vst [vmem:[#allocation2 - $0x3] sm:$0x80] %v574_v53  ;;  %v575_v54 = vadd.f32 %v574_v53, %v510_v8  ;;  %v580_v55 = vrot.slane %v574_v53, 7 }
 0x2af   : > { %583 = vrot.lane.b32.xlu2 %v574_v53, %s1221_s27 }
 0x2b0   : > { %v582_v56 = vsel %vm316_vm0, %v577_v52, %v580_v55 }
 0x2b6   : > { %623 = vrot.lane.b32.xlu0 %v574_v53, %s1225_s10  ;;  %615 = vrot.lane.b32.xlu1 %v574_v53, %s1224_s24 }
 0x2b7   : > { %607 = vrot.lane.b32.xlu2 %v574_v53, %s1223_s30 }
 0x2be   : > { %601 = vrot.lane.b32.xlu1 %v582_v56, %s1222_s21  ;;  %585 = vrot.lane.b32.xlu0 %v582_v56, %s1221_s27 }
 0x2bf   : > { %593 = vrot.lane.b32.xlu2 %v582_v56, %s1220_s20 }
 0x2c6   : > { %625 = vrot.lane.b32.xlu1 %v582_v56, %s1225_s10  ;;  %609 = vrot.lane.b32.xlu0 %v582_v56, %s1223_s30 }
 0x2c7   : > { %617 = vrot.lane.b32.xlu2 %v582_v56, %s1224_s24 }
 0x2ce   : > { %633 = vrot.lane.b32.xlu0 %v582_v56, %s1226_s17 }
 0x2cf   : > { %631 = vrot.lane.b32.xlu2 %v574_v53, %s1226_s17 }
 0x309   : > { %v584_v57 = vpop.permute.xlu2 %583 }
 0x311   : > { %v608_v60 = vpop.permute.xlu2 %607 }
 0x319   : > { %v594_v63 = vpop.permute.xlu2 %593 }
 0x320   : > { %v600_v58 = vpop.permute.xlu0 %599  ;;  %v592_v59 = vpop.permute.xlu1 %591 }
 0x321   : > { %v595_v3 = vsel %vm305_vm1, %v594_v63, %v592_v59  ;;  %v618_v8 = vpop.permute.xlu2 %617 }
 0x322   : > { %v597_v6 = vmul.f32 %v1422_v13, %v595_v3 }
 0x328   : > { %v624_v61 = vpop.permute.xlu0 %623  ;;  %v616_v62 = vpop.permute.xlu1 %615 }
 0x329   : > { %v619_v14 = vsel %vm308_vm5, %v618_v8, %v616_v62  ;;  %v632_v26 = vpop.permute.xlu2 %631  ;;  %v706_v62 = vld [vmem:[%s257_s25] sm:$0xff] }
 0x32a   : > { %v621_v20 = vmul.f32 %v1447_v27, %v619_v14 }
 0x330   : > { %v602_v0 = vpop.permute.xlu1 %601  ;;  %v586_v2 = vpop.permute.xlu0 %585 }
 0x331   : > { %v587_v4 = vsel %vm304_vm2, %v586_v2, %v584_v57  ;;  %v603_v7 = vsel %vm306_vm3, %v602_v0, %v600_v58  ;;  %v707_v0 = vmul.f32 1.442695, %v706_v62 }
 0x332   : > { %v589_v5 = vmul.f32 %v587_v4, %v1427_v15  ;;  %v605_v10 = vmul.f32 %v1436_v22, %v603_v7 }
 0x333   : > { %1020 = vpow2.f32 %v707_v0 }
 0x334   : > { %v598_v9 = vadd.f32 %v597_v6, %v589_v5 }
 0x336   : > { %v606_v18 = vadd.f32 %v605_v10, %v598_v9 }
 0x338   : > { %v610_v11 = vpop.permute.xlu0 %609  ;;  %v626_v17 = vpop.permute.xlu1 %625 }
 0x339   : > { %v611_v16 = vsel %vm307_vm4, %v610_v11, %v608_v60  ;;  %v627_v23 = vsel %vm309_vm6, %v626_v17, %v624_v61  ;;  %v1021_v9 = vpop.eup %1020 }
 0x33a   : > { %v613_v19 = vmul.f32 %v1441_v24, %v611_v16  ;;  %v629_v28 = vmul.f32 %v1456_v37, %v627_v23 }
 0x33c   : > { %v614_v21 = vadd.f32 %v613_v19, %v606_v18 }
 0x33e   : > { %v622_v25 = vadd.f32 %v621_v20, %v614_v21 }
 0x340   : > { %v634_v29 = vpop.permute.xlu0 %633  ;;  %v630_v31 = vadd.f32 %v629_v28, %v622_v25 }
 0x341   : > { %v635_v30 = vsel %vm310_vm7, %v634_v29, %v632_v26 }
 0x342   : > { %v637_v32 = vmul.f32 %v1462_v40, %v635_v30 }
 0x344   : > { %v638_v33 = vadd.f32 %v637_v32, %v630_v31 }
 0x346   : > { %v639_v34 = vmul.f32 0.2, %v638_v33 }
 0x348   : > { %664 = vrot.lane.b32.xlu2 %v639_v34, %s1222_s21  ;;  %656 = vrot.lane.b32.xlu0 %v639_v34, %s1220_s20  ;;  %643 = vst [vmem:[#allocation2 - $0x2] sm:$0x80] %v639_v34  ;;  %v640_v35 = vadd.f32 %v639_v34, %v575_v54  ;;  %v645_v36 = vrot.slane %v639_v34, 7 }
 0x349   : > { %648 = vrot.lane.b32.xlu1 %v639_v34, %s1221_s27 }
 0x34a   : > { %v647_v38 = vsel %vm316_vm0, %v642_v1, %v645_v36 }
 0x350   : > { %688 = vrot.lane.b32.xlu2 %v639_v34, %s1225_s10  ;;  %680 = vrot.lane.b32.xlu0 %v639_v34, %s1224_s24 }
 0x351   : > { %672 = vrot.lane.b32.xlu1 %v639_v34, %s1223_s30 }
 0x358   : > { %666 = vrot.lane.b32.xlu0 %v647_v38, %s1222_s21  ;;  %650 = vrot.lane.b32.xlu2 %v647_v38, %s1221_s27 }
 0x359   : > { %658 = vrot.lane.b32.xlu1 %v647_v38, %s1220_s20  ;;  %s1132_s20 = scalar_lea.hbm %s1702_s3, 32 }
 0x35a   : > { %p1134_p10 = scmp.lt.s32.totalorder %s1132_s20, %s1128_s26 }
 0x35c   : > { %p1135_p11 = por %p1134_p10, %p1133_p8 }
 0x35e   : > { %p1136_p13 = pnand %p1135_p11, %p1131_p7 }
 0x360   : > { %690 = vrot.lane.b32.xlu0 %v647_v38, %s1225_s10  ;;  %674 = vrot.lane.b32.xlu2 %v647_v38, %s1223_s30 }
 0x361   : > { %682 = vrot.lane.b32.xlu1 %v647_v38, %s1224_s24 }
 0x368   : > { %698 = vrot.lane.b32.xlu2 %v647_v38, %s1226_s17 }
 0x369   : > { %696 = vrot.lane.b32.xlu1 %v639_v34, %s1226_s17 }
 0x3a2   : > { %v665_v39 = vpop.permute.xlu2 %664 }
 0x3aa   : > { %v689_v43 = vpop.permute.xlu2 %688 }
 0x3b2   : > { %v651_v46 = vpop.permute.xlu2 %650 }
 0x3ba   : > { %v657_v41 = vpop.permute.xlu0 %656  ;;  %v675_v55 = vpop.permute.xlu2 %674 }
 0x3bb   : > { %v649_v42 = vpop.permute.xlu1 %648 }
 0x3bc   : > { %v652_v47 = vsel %vm304_vm2, %v651_v46, %v649_v42 }
 0x3bd   : > { %v654_v51 = vmul.f32 %v652_v47, %v1427_v15 }
 0x3c2   : > { %v681_v44 = vpop.permute.xlu0 %680  ;;  %v699_v3 = vpop.permute.xlu2 %698 }
 0x3c3   : > { %v673_v45 = vpop.permute.xlu1 %672 }
 0x3c4   : > { %v676_v57 = vsel %vm307_vm4, %v675_v55, %v673_v45 }
 0x3c5   : > { %v678_v15 = vmul.f32 %v1441_v24, %v676_v57 }
 0x3ca   : > { %v667_v48 = vpop.permute.xlu0 %666 }
 0x3cb   : > { %v659_v49 = vpop.permute.xlu1 %658  ;;  %v668_v53 = vsel %vm306_vm3, %v667_v48, %v665_v39 }
 0x3cc   : > { %v660_v50 = vsel %vm305_vm1, %v659_v49, %v657_v41  ;;  %v670_v56 = vmul.f32 %v1436_v22, %v668_v53 }
 0x3cd   : > { %v662_v52 = vmul.f32 %v1422_v13, %v660_v50 }
 0x3cf   : > { %v663_v54 = vadd.f32 %v662_v52, %v654_v51 }
 0x3d1   : > { %v671_v58 = vadd.f32 %v670_v56, %v663_v54 }
 0x3d2   : > { %v691_v61 = vpop.permute.xlu0 %690 }
 0x3d3   : > { %v683_v59 = vpop.permute.xlu1 %682  ;;  %v679_v63 = vadd.f32 %v678_v15, %v671_v58  ;;  %v692_v22 = vsel %vm309_vm6, %v691_v61, %v689_v43 }
 0x3d4   : > { %v684_v60 = vsel %vm308_vm5, %v683_v59, %v681_v44  ;;  %v694_v4 = vmul.f32 %v1456_v37, %v692_v22 }
 0x3d5   : > { %v686_v13 = vmul.f32 %v1447_v27, %v684_v60 }
 0x3d7   : > { %v687_v2 = vadd.f32 %v686_v13, %v679_v63 }
 0x3d9   : > { %v695_v27 = vadd.f32 %v694_v4, %v687_v2 }
 0x3db   : > { %v697_v5 = vpop.permute.xlu1 %696 }
 0x3dc   : > { %v700_v24 = vsel %vm310_vm7, %v699_v3, %v697_v5 }
 0x3dd   : > { %v702_v6 = vmul.f32 %v1462_v40, %v700_v24 }
 0x3df   : > { %v703_v7 = vadd.f32 %v702_v6, %v695_v27 }
 0x3e1   : > { %v704_v8 = vmul.f32 0.16666667, %v703_v7 }
 0x3e3   : > { %v705_v12 = vadd.f32 %v704_v8, %v640_v35 }
 0x3e5   : > { %v709_v37 = vmul.f32 %v1021_v9, %v705_v12 }
 0x3e7   : > { %710 = vst [vmem:[%s290_s29] sm:$0xff] %v709_v37 }
 0x3e8   : > { %1139 = shalt.err (!%p1136_p13)
}
 0x3e9   : > { %927 = dma.vmem_to_hbm [thread:$0]  (%p1316_p9), %s727_s6, 128, %s729_s11, %s712_s14  }
 0x3ea PF: > { %p944_p0 = scmp.ge.s32.totalorder %s1214_s19, 2  ;;  %s740_s1 = sand.u32 1, %s1186_s12  }
 0x3eb   : > { %s741_s5 = scalar_lea.sflag [#allocation5], %s740_s1 }
 0x3ec   : > { %p940_p1 = pnand %p944_p0, %p1322_p12 }
 0x3ee   : > { %p941_p2 = pneg %p940_p1 }
 0x3f0   : > { %1181 = dma.done.wait (%p941_p2), %s741_s5, 128  }
 0x3f1   : > { %1183 = vsyncadd (%p941_p2), %s741_s5, 4294967168  ;;  %s22_s19 = sadd.s32 1, %s1214_s19   ;;  %s1722_s29 = sld [smem:[#allocation13_spill]] }
 0x3f2   : > { %p19_p3 = scmp.ge.s32.totalorder %s22_s19, 6   ;;  %s1723_s14 = sld [smem:[#allocation18_spill]] }
 0x3f3   : > { %s1724_s15 = sld [smem:[#allocation14_spill]]  ;;  %s1728_s12 = smov %s1190_s13 }
 0x3f4   : > { %s1725_s16 = sld [smem:[#allocation15_spill]]  ;;  %21 = sbr.rel (!%p19_p3) target bundleno = 11 (0xb), region = 116 }
 0x3f5   : > { %s1726_s17 = sld [smem:[#allocation16_spill]] }
 0x3f6   : > { %s1727_s18 = sld [smem:[#allocation17_spill]] }
 0x3f7   : > { %s1729_s13 = smov %s1722_s29 }
 0x3f9   :  { %747 = vsyncpa [#allocation4], 1 }
 0x3fa   :  { %749 = vsyncpa [#allocation4 + $0x1], 1 }
 0x3fb   :  { %750 = vsyncpa [#allocation7], 1 }
 0x3fc   :  { %752 = vsyncpa [#allocation7 + $0x1], 1 }
 0x3fd   :  { %753 = vsyncpa [#allocation5], 1 }
 0x3fe   :  { %755 = vsyncpa [#allocation5 + $0x1], 1 }

</bundles_post_ra>
